<compile_context>
chip_gen: v6e
topology: v6e:2x2x1
jax: 0.10.0
libtpu: 0.0.40
codegen_flags: <defaults>
</compile_context>

<pallas_src>
import functools

import jax
import jax.numpy as jnp
from jax.experimental import pallas as pl
from jax.experimental.pallas import tpu as pltpu

KSIZE = 7
PAD = (KSIZE - 1) // 2  # = 3


def spatial_gate_kernel(x_ref, w_ref, b_ref, o_ref, padf_ref, *, width):
    # x_ref   : (Nb, C, H*W)                         VMEM (lane-dense spatial dims)
    # w_ref   : (2*7*7,)                             SMEM conv weight, [cin, kh, kw]
    # b_ref   : (1,)                                 SMEM conv bias
    # o_ref   : (Nb, C, H*W)                         VMEM
    # padf_ref: (2, Nb, H*W + 2*(PAD*width + PAD))   VMEM scratch (flat zero-padded)
    nb, _, hw = x_ref.shape
    pad_off = PAD * width + PAD          # flat padding covers every dy*W + dx offset
    hwp = hw + 2 * pad_off

    # --- ChannelPool: max / mean over C, in f32, lane-dense (Nb, HW) ---
    x = x_ref[...].astype(jnp.float32)               # (Nb, C, HW)
    ch_max = jnp.max(x, axis=1)                      # (Nb, HW)
    ch_mean = jnp.mean(x, axis=1)                    # (Nb, HW)

    # Keep the flat padding borders zero.  Only 2 * pad_off lanes -> cheap; done
    # unconditionally so it is correct when the batch grid is sharded across cores.
    zeros_border = jnp.zeros((2, nb, pad_off), jnp.float32)
    padf_ref[:, :, 0:pad_off] = zeros_border
    padf_ref[:, :, pad_off + hw:hwp] = zeros_border
    padf_ref[0, :, pad_off:pad_off + hw] = ch_max
    padf_ref[1, :, pad_off:pad_off + hw] = ch_mean

    # --- 7x7 conv (2 -> 1 channel, stride 1, pad 3) directly on the flat layout ---
    # out[p] = b + sum_{c,dy,dx} w[c,dy,dx] * padded2d[c, i+dy, j+dx],  p = i*W + j.
    # On the flat buffer that tap is padf[c, pad_off + p + dy*W + dx]; the only extra
    # care is the horizontal wrap across rows, handled by a per-dx column mask that
    # is hoisted and factored out of the dy accumulation.
    col = jax.lax.broadcasted_iota(jnp.int32, (1, hw), 1) % width
    acc = jnp.full((nb, hw), b_ref[0], dtype=jnp.float32)
    for dx in range(-PAD, PAD + 1):
        maskf = ((col + dx >= 0) & (col + dx < width)).astype(jnp.float32)  # (1, HW)
        for cin in range(2):
            partial = jnp.zeros((nb, hw), jnp.float32)
            for dy in range(-PAD, PAD + 1):
                off = pad_off + dy * width + dx
                w = w_ref[cin * KSIZE * KSIZE + (dy + PAD) * KSIZE + (dx + PAD)]
                partial = partial + w * padf_ref[cin, :, off:off + hw]
            acc = acc + partial * maskf

    # --- sigmoid gate, broadcast over channels, lane-dense store ---
    scale = jax.nn.sigmoid(acc)                      # (Nb, HW) f32
    o_ref[...] = (x * scale[:, None, :]).astype(o_ref.dtype)


def spatial_gate(x, conv_w, conv_b, *, block_batch=None):
    """x: (N, C, H, W); conv_w: (1, 2, 7, 7) OIHW; conv_b: (1,)."""
    N, C, H, W = x.shape
    if conv_w.shape != (1, 2, KSIZE, KSIZE):
        raise ValueError(f"conv_w must be (1, 2, {KSIZE}, {KSIZE}) OIHW, got {conv_w.shape}")
    if conv_b.shape != (1,):
        raise ValueError(f"conv_b must be (1,), got {conv_b.shape}")

    HW = H * W
    x_flat = x.reshape(N, C, HW)                     # free, contiguous reshape
    w_flat = conv_w.reshape(-1).astype(jnp.float32)  # (98,) scalars -> SMEM
    b_flat = conv_b.reshape(-1).astype(jnp.float32)  # (1,)

    # Batch elements per grid step: big enough to amortize per-step overhead, small
    # enough that the double-buffered in+out blocks stay well inside VMEM.
    if block_batch is None:
        per_elem = C * HW * x.dtype.itemsize
        budget = 4 * 1024 * 1024
        nb = max(1, min(N, budget // max(per_elem, 1)))
        while N % nb:
            nb -= 1
        block_batch = nb
    Nb = int(block_batch)
    assert N % Nb == 0

    pad_off = PAD * W + PAD
    HWP = HW + 2 * pad_off
    block_bytes = Nb * C * HW * x.dtype.itemsize
    scratch_bytes = 2 * Nb * HWP * 4
    vmem_limit = int(min(64 * 1024 * 1024,
                         max(32 * 1024 * 1024,
                             4 * block_bytes + 2 * scratch_bytes + (2 << 20))))

    out_flat = pl.pallas_call(
        functools.partial(spatial_gate_kernel, width=W),
        out_shape=jax.ShapeDtypeStruct((N, C, HW), x.dtype),
        grid=(N // Nb,),
        in_specs=[
            pl.BlockSpec((Nb, C, HW), lambda n: (n, 0, 0)),
            pl.BlockSpec(memory_space=pltpu.MemorySpace.SMEM),  # conv weights (scalars)
            pl.BlockSpec(memory_space=pltpu.MemorySpace.SMEM),  # conv bias
        ],
        out_specs=pl.BlockSpec((Nb, C, HW), lambda n: (n, 0, 0)),
        scratch_shapes=[pltpu.VMEM((2, Nb, HWP), jnp.float32)],
        compiler_params=pltpu.CompilerParams(
            dimension_semantics=("parallel",),       # batch steps are independent (v7x: 2 TCs)
            vmem_limit_bytes=vmem_limit,
        ),
    )(x_flat, w_flat, b_flat)
    return out_flat.reshape(N, C, H, W)


def spatial_gate_reference(x, conv_w, conv_b):
    """Pure-JAX reference matching the PyTorch forward."""
    mx = jnp.max(x, axis=1, keepdims=True)
    mn = jnp.mean(x, axis=1, keepdims=True)
    pooled = jnp.concatenate([mx, mn], axis=1)       # (N, 2, H, W)
    out = jax.lax.conv_general_dilated(
        pooled, conv_w, window_strides=(1, 1),
        padding=((PAD, PAD), (PAD, PAD)),
        dimension_numbers=("NCHW", "OIHW", "NCHW"),
    ) + conv_b.reshape(1, 1, 1, 1)
    return x * jax.nn.sigmoid(out)


if __name__ == "__main__":
    key = jax.random.PRNGKey(0)
    kx, kw, kb = jax.random.split(key, 3)

    N, C, H, W = 2, 4, 16, 16
    x = jax.random.normal(kx, (N, C, H, W), dtype=jnp.float32)
    # Deterministic synthetic conv parameters (nn.Conv2d(2, 1, 7) shapes, OIHW).
    conv_w = 0.1 * jax.random.normal(kw, (1, 2, KSIZE, KSIZE), dtype=jnp.float32)
    conv_b = 0.1 * jax.random.normal(kb, (1,), dtype=jnp.float32)

    out = spatial_gate(x, conv_w, conv_b)
    jax.block_until_ready(out)

    ref = spatial_gate_reference(x, conv_w, conv_b)
    assert out.shape == x.shape and out.dtype == x.dtype
    err = float(jnp.max(jnp.abs(out - ref)))
    assert jnp.allclose(out, ref, atol=1e-4, rtol=1e-4), err

    print("KERNEL_OK")
</pallas_src>

<mosaic_0001>
module attributes {stable_mosaic.version = 11 : i64} {
  func.func @spatial_gate_kernel(%arg0: i32, %arg1: memref<2x4x256xf32, #tpu.memory_space<vmem>>, %arg2: memref<98xf32, #tpu.memory_space<smem>>, %arg3: memref<1xf32, #tpu.memory_space<smem>>, %arg4: memref<2x4x256xf32, #tpu.memory_space<vmem>>, %arg5: memref<2x2x358xf32, #tpu.memory_space<vmem>>) attributes {dimension_semantics = [#tpu.dimension_semantics<parallel>], iteration_bounds = array<i64: 1>, scalar_prefetch = 0 : i64, scratch_operands = 1 : i64, tpu.core_type = #tpu.core_type<tc>, window_params = [{transform_indices = @transform_0, window_bounds = array<i64: 2, 4, 256>}, {transform_indices = @transform_1, window_bounds = array<i64: 98>}, {transform_indices = @transform_2, window_bounds = array<i64: 1>}, {transform_indices = @transform_3, window_bounds = array<i64: 2, 4, 256>}]} {
    %c0 = arith.constant 0 : index
    %c0_0 = arith.constant 0 : index
    %c0_1 = arith.constant 0 : index
    %0 = vector.load %arg1[%c0, %c0_0, %c0_1] : memref<2x4x256xf32, #tpu.memory_space<vmem>>, vector<2x4x256xf32>
    %cst = arith.constant dense<0xFF800000> : vector<2x256xf32>
    %1 = vector.multi_reduction <maximumf>, %0, %cst [1] : vector<2x4x256xf32> to vector<2x256xf32>
    %cst_2 = arith.constant dense<0.000000e+00> : vector<2x256xf32>
    %2 = vector.multi_reduction <add>, %0, %cst_2 [1] : vector<2x4x256xf32> to vector<2x256xf32>
    %cst_3 = arith.constant 4.000000e+00 : f32
    %3 = vector.broadcast %cst_3 : f32 to vector<2x256xf32>
    %4 = arith.divf %2, %3 : vector<2x256xf32>
    %cst_4 = arith.constant 0.000000e+00 : f32
    %5 = vector.broadcast %cst_4 : f32 to vector<2x2x51xf32>
    %c0_5 = arith.constant 0 : index
    %c0_6 = arith.constant 0 : index
    %c0_7 = arith.constant 0 : index
    %6 = vector.load %arg5[%c0_5, %c0_6, %c0_7] : memref<2x2x358xf32, #tpu.memory_space<vmem>>, vector<2x2x51xf32>
    tpu.vector_store %arg5[%c0_5, %c0_6, %c0_7], %5 {strides = array<i32>} : memref<2x2x358xf32, #tpu.memory_space<vmem>>, vector<2x2x51xf32>,
    %c0_8 = arith.constant 0 : index
    %c0_9 = arith.constant 0 : index
    %c307 = arith.constant 307 : index
    %7 = vector.load %arg5[%c0_8, %c0_9, %c307] : memref<2x2x358xf32, #tpu.memory_space<vmem>>, vector<2x2x51xf32>
    tpu.vector_store %arg5[%c0_8, %c0_9, %c307], %5 {strides = array<i32>} : memref<2x2x358xf32, #tpu.memory_space<vmem>>, vector<2x2x51xf32>,
    %c0_10 = arith.constant 0 : index
    %c0_11 = arith.constant 0 : index
    %c51 = arith.constant 51 : index
    %8 = vector.load %arg5[%c0_10, %c0_11, %c51] : memref<2x2x358xf32, #tpu.memory_space<vmem>>, vector<1x2x256xf32>
    %9 = vector.shape_cast %8 : vector<1x2x256xf32> to vector<2x256xf32>
    %10 = vector.shape_cast %1 : vector<2x256xf32> to vector<1x2x256xf32>
    tpu.vector_store %arg5[%c0_10, %c0_11, %c51], %10 {strides = array<i32>} : memref<2x2x358xf32, #tpu.memory_space<vmem>>, vector<1x2x256xf32>,
    %c1 = arith.constant 1 : index
    %c0_12 = arith.constant 0 : index
    %c51_13 = arith.constant 51 : index
    %11 = vector.load %arg5[%c1, %c0_12, %c51_13] : memref<2x2x358xf32, #tpu.memory_space<vmem>>, vector<1x2x256xf32>
    %12 = vector.shape_cast %11 : vector<1x2x256xf32> to vector<2x256xf32>
    %13 = vector.shape_cast %4 : vector<2x256xf32> to vector<1x2x256xf32>
    tpu.vector_store %arg5[%c1, %c0_12, %c51_13], %13 {strides = array<i32>} : memref<2x2x358xf32, #tpu.memory_space<vmem>>, vector<1x2x256xf32>,
    %14 = tpu.iota {dimensions = array<i32: 1>} : vector<1x256xi32>
    %c16_i32 = arith.constant 16 : i32
    %c0_i32 = arith.constant 0 : i32
    %15 = arith.cmpi eq, %c16_i32, %c0_i32 : i32
    %c1_i32 = arith.constant 1 : i32
    %16 = arith.select %15, %c1_i32, %c16_i32 : i32
    %17 = vector.broadcast %16 : i32 to vector<1x256xi32>
    %18 = arith.remsi %14, %17 : vector<1x256xi32>
    %c0_i32_14 = arith.constant 0 : i32
    %19 = vector.broadcast %c0_i32_14 : i32 to vector<1x256xi32>
    %20 = arith.cmpi ne, %18, %19 : vector<1x256xi32>
    %c0_i32_15 = arith.constant 0 : i32
    %21 = vector.broadcast %c0_i32_15 : i32 to vector<1x256xi32>
    %22 = arith.cmpi slt, %18, %21 : vector<1x256xi32>
    %c0_i32_16 = arith.constant 0 : i32
    %23 = arith.cmpi slt, %16, %c0_i32_16 : i32
    %24 = vector.broadcast %23 : i1 to vector<1x256xi1>
    %25 = vector.broadcast %24 : vector<1x256xi1> to vector<1x256xi1>
    %26 = arith.xori %22, %25 : vector<1x256xi1>
    %27 = arith.andi %26, %20 : vector<1x256xi1>
    %28 = vector.broadcast %16 : i32 to vector<1x256xi32>
    %29 = arith.addi %18, %28 : vector<1x256xi32>
    %30 = arith.select %27, %29, %18 : vector<1x256xi1>, vector<1x256xi32>
    %c0_17 = arith.constant 0 : index
    %31 = memref.load %arg3[%c0_17] : memref<1xf32, #tpu.memory_space<smem>>
    %32 = vector.broadcast %31 : f32 to vector<2x256xf32>
    %c-3_i32 = arith.constant -3 : i32
    %33 = vector.broadcast %c-3_i32 : i32 to vector<1x256xi32>
    %34 = arith.addi %30, %33 : vector<1x256xi32>
    %c0_i32_18 = arith.constant 0 : i32
    %35 = vector.broadcast %c0_i32_18 : i32 to vector<1x256xi32>
    %36 = arith.cmpi sge, %34, %35 : vector<1x256xi32>
    %c-3_i32_19 = arith.constant -3 : i32
    %37 = vector.broadcast %c-3_i32_19 : i32 to vector<1x256xi32>
    %38 = arith.addi %30, %37 : vector<1x256xi32>
    %c16_i32_20 = arith.constant 16 : i32
    %39 = vector.broadcast %c16_i32_20 : i32 to vector<1x256xi32>
    %40 = arith.cmpi slt, %38, %39 : vector<1x256xi32>
    %41 = arith.andi %36, %40 : vector<1x256xi1>
    %42 = arith.extui %41 : vector<1x256xi1> to vector<1x256xi32>
    %43 = arith.sitofp %42 : vector<1x256xi32> to vector<1x256xf32>
    %cst_21 = arith.constant 0.000000e+00 : f32
    %44 = vector.broadcast %cst_21 : f32 to vector<2x256xf32>
    %c0_22 = arith.constant 0 : index
    %45 = memref.load %arg2[%c0_22] : memref<98xf32, #tpu.memory_space<smem>>
    %c0_23 = arith.constant 0 : index
    %c0_24 = arith.constant 0 : index
    %c0_25 = arith.constant 0 : index
    %46 = vector.load %arg5[%c0_23, %c0_24, %c0_25] : memref<2x2x358xf32, #tpu.memory_space<vmem>>, vector<1x2x256xf32>
    %47 = vector.shape_cast %46 : vector<1x2x256xf32> to vector<2x256xf32>
    %48 = vector.broadcast %45 : f32 to vector<2x256xf32>
    %49 = arith.mulf %48, %47 : vector<2x256xf32>
    %50 = arith.addf %44, %49 : vector<2x256xf32>
    %c7 = arith.constant 7 : index
    %51 = memref.load %arg2[%c7] : memref<98xf32, #tpu.memory_space<smem>>
    %c0_26 = arith.constant 0 : index
    %c0_27 = arith.constant 0 : index
    %c16 = arith.constant 16 : index
    %52 = vector.load %arg5[%c0_26, %c0_27, %c16] : memref<2x2x358xf32, #tpu.memory_space<vmem>>, vector<1x2x256xf32>
    %53 = vector.shape_cast %52 : vector<1x2x256xf32> to vector<2x256xf32>
    %54 = vector.broadcast %51 : f32 to vector<2x256xf32>
    %55 = arith.mulf %54, %53 : vector<2x256xf32>
    %56 = arith.addf %50, %55 : vector<2x256xf32>
    %c14 = arith.constant 14 : index
    %57 = memref.load %arg2[%c14] : memref<98xf32, #tpu.memory_space<smem>>
    %c0_28 = arith.constant 0 : index
    %c0_29 = arith.constant 0 : index
    %c32 = arith.constant 32 : index
    %58 = vector.load %arg5[%c0_28, %c0_29, %c32] : memref<2x2x358xf32, #tpu.memory_space<vmem>>, vector<1x2x256xf32>
    %59 = vector.shape_cast %58 : vector<1x2x256xf32> to vector<2x256xf32>
    %60 = vector.broadcast %57 : f32 to vector<2x256xf32>
    %61 = arith.mulf %60, %59 : vector<2x256xf32>
    %62 = arith.addf %56, %61 : vector<2x256xf32>
    %c21 = arith.constant 21 : index
    %63 = memref.load %arg2[%c21] : memref<98xf32, #tpu.memory_space<smem>>
    %c0_30 = arith.constant 0 : index
    %c0_31 = arith.constant 0 : index
    %c48 = arith.constant 48 : index
    %64 = vector.load %arg5[%c0_30, %c0_31, %c48] : memref<2x2x358xf32, #tpu.memory_space<vmem>>, vector<1x2x256xf32>
    %65 = vector.shape_cast %64 : vector<1x2x256xf32> to vector<2x256xf32>
    %66 = vector.broadcast %63 : f32 to vector<2x256xf32>
    %67 = arith.mulf %66, %65 : vector<2x256xf32>
    %68 = arith.addf %62, %67 : vector<2x256xf32>
    %c28 = arith.constant 28 : index
    %69 = memref.load %arg2[%c28] : memref<98xf32, #tpu.memory_space<smem>>
    %c0_32 = arith.constant 0 : index
    %c0_33 = arith.constant 0 : index
    %c64 = arith.constant 64 : index
    %70 = vector.load %arg5[%c0_32, %c0_33, %c64] : memref<2x2x358xf32, #tpu.memory_space<vmem>>, vector<1x2x256xf32>
    %71 = vector.shape_cast %70 : vector<1x2x256xf32> to vector<2x256xf32>
    %72 = vector.broadcast %69 : f32 to vector<2x256xf32>
    %73 = arith.mulf %72, %71 : vector<2x256xf32>
    %74 = arith.addf %68, %73 : vector<2x256xf32>
    %c35 = arith.constant 35 : index
    %75 = memref.load %arg2[%c35] : memref<98xf32, #tpu.memory_space<smem>>
    %c0_34 = arith.constant 0 : index
    %c0_35 = arith.constant 0 : index
    %c80 = arith.constant 80 : index
    %76 = vector.load %arg5[%c0_34, %c0_35, %c80] : memref<2x2x358xf32, #tpu.memory_space<vmem>>, vector<1x2x256xf32>
    %77 = vector.shape_cast %76 : vector<1x2x256xf32> to vector<2x256xf32>
    %78 = vector.broadcast %75 : f32 to vector<2x256xf32>
    %79 = arith.mulf %78, %77 : vector<2x256xf32>
    %80 = arith.addf %74, %79 : vector<2x256xf32>
    %c42 = arith.constant 42 : index
    %81 = memref.load %arg2[%c42] : memref<98xf32, #tpu.memory_space<smem>>
    %c0_36 = arith.constant 0 : index
    %c0_37 = arith.constant 0 : index
    %c96 = arith.constant 96 : index
    %82 = vector.load %arg5[%c0_36, %c0_37, %c96] : memref<2x2x358xf32, #tpu.memory_space<vmem>>, vector<1x2x256xf32>
    %83 = vector.shape_cast %82 : vector<1x2x256xf32> to vector<2x256xf32>
    %84 = vector.broadcast %81 : f32 to vector<2x256xf32>
    %85 = arith.mulf %84, %83 : vector<2x256xf32>
    %86 = arith.addf %80, %85 : vector<2x256xf32>
    %87 = vector.broadcast %43 : vector<1x256xf32> to vector<2x256xf32>
    %88 = arith.mulf %86, %87 : vector<2x256xf32>
    %89 = arith.addf %32, %88 : vector<2x256xf32>
    %cst_38 = arith.constant 0.000000e+00 : f32
    %90 = vector.broadcast %cst_38 : f32 to vector<2x256xf32>
    %c49 = arith.constant 49 : index
    %91 = memref.load %arg2[%c49] : memref<98xf32, #tpu.memory_space<smem>>
    %c1_39 = arith.constant 1 : index
    %c0_40 = arith.constant 0 : index
    %c0_41 = arith.constant 0 : index
    %92 = vector.load %arg5[%c1_39, %c0_40, %c0_41] : memref<2x2x358xf32, #tpu.memory_space<vmem>>, vector<1x2x256xf32>
    %93 = vector.shape_cast %92 : vector<1x2x256xf32> to vector<2x256xf32>
    %94 = vector.broadcast %91 : f32 to vector<2x256xf32>
    %95 = arith.mulf %94, %93 : vector<2x256xf32>
    %96 = arith.addf %90, %95 : vector<2x256xf32>
    %c56 = arith.constant 56 : index
    %97 = memref.load %arg2[%c56] : memref<98xf32, #tpu.memory_space<smem>>
    %c1_42 = arith.constant 1 : index
    %c0_43 = arith.constant 0 : index
    %c16_44 = arith.constant 16 : index
    %98 = vector.load %arg5[%c1_42, %c0_43, %c16_44] : memref<2x2x358xf32, #tpu.memory_space<vmem>>, vector<1x2x256xf32>
    %99 = vector.shape_cast %98 : vector<1x2x256xf32> to vector<2x256xf32>
    %100 = vector.broadcast %97 : f32 to vector<2x256xf32>
    %101 = arith.mulf %100, %99 : vector<2x256xf32>
    %102 = arith.addf %96, %101 : vector<2x256xf32>
    %c63 = arith.constant 63 : index
    %103 = memref.load %arg2[%c63] : memref<98xf32, #tpu.memory_space<smem>>
    %c1_45 = arith.constant 1 : index
    %c0_46 = arith.constant 0 : index
    %c32_47 = arith.constant 32 : index
    %104 = vector.load %arg5[%c1_45, %c0_46, %c32_47] : memref<2x2x358xf32, #tpu.memory_space<vmem>>, vector<1x2x256xf32>
    %105 = vector.shape_cast %104 : vector<1x2x256xf32> to vector<2x256xf32>
    %106 = vector.broadcast %103 : f32 to vector<2x256xf32>
    %107 = arith.mulf %106, %105 : vector<2x256xf32>
    %108 = arith.addf %102, %107 : vector<2x256xf32>
    %c70 = arith.constant 70 : index
    %109 = memref.load %arg2[%c70] : memref<98xf32, #tpu.memory_space<smem>>
    %c1_48 = arith.constant 1 : index
    %c0_49 = arith.constant 0 : index
    %c48_50 = arith.constant 48 : index
    %110 = vector.load %arg5[%c1_48, %c0_49, %c48_50] : memref<2x2x358xf32, #tpu.memory_space<vmem>>, vector<1x2x256xf32>
    %111 = vector.shape_cast %110 : vector<1x2x256xf32> to vector<2x256xf32>
    %112 = vector.broadcast %109 : f32 to vector<2x256xf32>
    %113 = arith.mulf %112, %111 : vector<2x256xf32>
    %114 = arith.addf %108, %113 : vector<2x256xf32>
    %c77 = arith.constant 77 : index
    %115 = memref.load %arg2[%c77] : memref<98xf32, #tpu.memory_space<smem>>
    %c1_51 = arith.constant 1 : index
    %c0_52 = arith.constant 0 : index
    %c64_53 = arith.constant 64 : index
    %116 = vector.load %arg5[%c1_51, %c0_52, %c64_53] : memref<2x2x358xf32, #tpu.memory_space<vmem>>, vector<1x2x256xf32>
    %117 = vector.shape_cast %116 : vector<1x2x256xf32> to vector<2x256xf32>
    %118 = vector.broadcast %115 : f32 to vector<2x256xf32>
    %119 = arith.mulf %118, %117 : vector<2x256xf32>
    %120 = arith.addf %114, %119 : vector<2x256xf32>
    %c84 = arith.constant 84 : index
    %121 = memref.load %arg2[%c84] : memref<98xf32, #tpu.memory_space<smem>>
    %c1_54 = arith.constant 1 : index
    %c0_55 = arith.constant 0 : index
    %c80_56 = arith.constant 80 : index
    %122 = vector.load %arg5[%c1_54, %c0_55, %c80_56] : memref<2x2x358xf32, #tpu.memory_space<vmem>>, vector<1x2x256xf32>
    %123 = vector.shape_cast %122 : vector<1x2x256xf32> to vector<2x256xf32>
    %124 = vector.broadcast %121 : f32 to vector<2x256xf32>
    %125 = arith.mulf %124, %123 : vector<2x256xf32>
    %126 = arith.addf %120, %125 : vector<2x256xf32>
    %c91 = arith.constant 91 : index
    %127 = memref.load %arg2[%c91] : memref<98xf32, #tpu.memory_space<smem>>
    %c1_57 = arith.constant 1 : index
    %c0_58 = arith.constant 0 : index
    %c96_59 = arith.constant 96 : index
    %128 = vector.load %arg5[%c1_57, %c0_58, %c96_59] : memref<2x2x358xf32, #tpu.memory_space<vmem>>, vector<1x2x256xf32>
    %129 = vector.shape_cast %128 : vector<1x2x256xf32> to vector<2x256xf32>
    %130 = vector.broadcast %127 : f32 to vector<2x256xf32>
    %131 = arith.mulf %130, %129 : vector<2x256xf32>
    %132 = arith.addf %126, %131 : vector<2x256xf32>
    %133 = vector.broadcast %43 : vector<1x256xf32> to vector<2x256xf32>
    %134 = arith.mulf %132, %133 : vector<2x256xf32>
    %135 = arith.addf %89, %134 : vector<2x256xf32>
    %c-2_i32 = arith.constant -2 : i32
    %136 = vector.broadcast %c-2_i32 : i32 to vector<1x256xi32>
    %137 = arith.addi %30, %136 : vector<1x256xi32>
    %c0_i32_60 = arith.constant 0 : i32
    %138 = vector.broadcast %c0_i32_60 : i32 to vector<1x256xi32>
    %139 = arith.cmpi sge, %137, %138 : vector<1x256xi32>
    %c-2_i32_61 = arith.constant -2 : i32
    %140 = vector.broadcast %c-2_i32_61 : i32 to vector<1x256xi32>
    %141 = arith.addi %30, %140 : vector<1x256xi32>
    %c16_i32_62 = arith.constant 16 : i32
    %142 = vector.broadcast %c16_i32_62 : i32 to vector<1x256xi32>
    %143 = arith.cmpi slt, %141, %142 : vector<1x256xi32>
    %144 = arith.andi %139, %143 : vector<1x256xi1>
    %145 = arith.extui %144 : vector<1x256xi1> to vector<1x256xi32>
    %146 = arith.sitofp %145 : vector<1x256xi32> to vector<1x256xf32>
    %cst_63 = arith.constant 0.000000e+00 : f32
    %147 = vector.broadcast %cst_63 : f32 to vector<2x256xf32>
    %c1_64 = arith.constant 1 : index
    %148 = memref.load %arg2[%c1_64] : memref<98xf32, #tpu.memory_space<smem>>
    %c0_65 = arith.constant 0 : index
    %c0_66 = arith.constant 0 : index
    %c1_67 = arith.constant 1 : index
    %149 = vector.load %arg5[%c0_65, %c0_66, %c1_67] : memref<2x2x358xf32, #tpu.memory_space<vmem>>, vector<1x2x256xf32>
    %150 = vector.shape_cast %149 : vector<1x2x256xf32> to vector<2x256xf32>
    %151 = vector.broadcast %148 : f32 to vector<2x256xf32>
    %152 = arith.mulf %151, %150 : vector<2x256xf32>
    %153 = arith.addf %147, %152 : vector<2x256xf32>
    %c8 = arith.constant 8 : index
    %154 = memref.load %arg2[%c8] : memref<98xf32, #tpu.memory_space<smem>>
    %c0_68 = arith.constant 0 : index
    %c0_69 = arith.constant 0 : index
    %c17 = arith.constant 17 : index
    %155 = vector.load %arg5[%c0_68, %c0_69, %c17] : memref<2x2x358xf32, #tpu.memory_space<vmem>>, vector<1x2x256xf32>
    %156 = vector.shape_cast %155 : vector<1x2x256xf32> to vector<2x256xf32>
    %157 = vector.broadcast %154 : f32 to vector<2x256xf32>
    %158 = arith.mulf %157, %156 : vector<2x256xf32>
    %159 = arith.addf %153, %158 : vector<2x256xf32>
    %c15 = arith.constant 15 : index
    %160 = memref.load %arg2[%c15] : memref<98xf32, #tpu.memory_space<smem>>
    %c0_70 = arith.constant 0 : index
    %c0_71 = arith.constant 0 : index
    %c33 = arith.constant 33 : index
    %161 = vector.load %arg5[%c0_70, %c0_71, %c33] : memref<2x2x358xf32, #tpu.memory_space<vmem>>, vector<1x2x256xf32>
    %162 = vector.shape_cast %161 : vector<1x2x256xf32> to vector<2x256xf32>
    %163 = vector.broadcast %160 : f32 to vector<2x256xf32>
    %164 = arith.mulf %163, %162 : vector<2x256xf32>
    %165 = arith.addf %159, %164 : vector<2x256xf32>
    %c22 = arith.constant 22 : index
    %166 = memref.load %arg2[%c22] : memref<98xf32, #tpu.memory_space<smem>>
    %c0_72 = arith.constant 0 : index
    %c0_73 = arith.constant 0 : index
    %c49_74 = arith.constant 49 : index
    %167 = vector.load %arg5[%c0_72, %c0_73, %c49_74] : memref<2x2x358xf32, #tpu.memory_space<vmem>>, vector<1x2x256xf32>
    %168 = vector.shape_cast %167 : vector<1x2x256xf32> to vector<2x256xf32>
    %169 = vector.broadcast %166 : f32 to vector<2x256xf32>
    %170 = arith.mulf %169, %168 : vector<2x256xf32>
    %171 = arith.addf %165, %170 : vector<2x256xf32>
    %c29 = arith.constant 29 : index
    %172 = memref.load %arg2[%c29] : memref<98xf32, #tpu.memory_space<smem>>
    %c0_75 = arith.constant 0 : index
    %c0_76 = arith.constant 0 : index
    %c65 = arith.constant 65 : index
    %173 = vector.load %arg5[%c0_75, %c0_76, %c65] : memref<2x2x358xf32, #tpu.memory_space<vmem>>, vector<1x2x256xf32>
    %174 = vector.shape_cast %173 : vector<1x2x256xf32> to vector<2x256xf32>
    %175 = vector.broadcast %172 : f32 to vector<2x256xf32>
    %176 = arith.mulf %175, %174 : vector<2x256xf32>
    %177 = arith.addf %171, %176 : vector<2x256xf32>
    %c36 = arith.constant 36 : index
    %178 = memref.load %arg2[%c36] : memref<98xf32, #tpu.memory_space<smem>>
    %c0_77 = arith.constant 0 : index
    %c0_78 = arith.constant 0 : index
    %c81 = arith.constant 81 : index
    %179 = vector.load %arg5[%c0_77, %c0_78, %c81] : memref<2x2x358xf32, #tpu.memory_space<vmem>>, vector<1x2x256xf32>
    %180 = vector.shape_cast %179 : vector<1x2x256xf32> to vector<2x256xf32>
    %181 = vector.broadcast %178 : f32 to vector<2x256xf32>
    %182 = arith.mulf %181, %180 : vector<2x256xf32>
    %183 = arith.addf %177, %182 : vector<2x256xf32>
    %c43 = arith.constant 43 : index
    %184 = memref.load %arg2[%c43] : memref<98xf32, #tpu.memory_space<smem>>
    %c0_79 = arith.constant 0 : index
    %c0_80 = arith.constant 0 : index
    %c97 = arith.constant 97 : index
    %185 = vector.load %arg5[%c0_79, %c0_80, %c97] : memref<2x2x358xf32, #tpu.memory_space<vmem>>, vector<1x2x256xf32>
    %186 = vector.shape_cast %185 : vector<1x2x256xf32> to vector<2x256xf32>
    %187 = vector.broadcast %184 : f32 to vector<2x256xf32>
    %188 = arith.mulf %187, %186 : vector<2x256xf32>
    %189 = arith.addf %183, %188 : vector<2x256xf32>
    %190 = vector.broadcast %146 : vector<1x256xf32> to vector<2x256xf32>
    %191 = arith.mulf %189, %190 : vector<2x256xf32>
    %192 = arith.addf %135, %191 : vector<2x256xf32>
    %cst_81 = arith.constant 0.000000e+00 : f32
    %193 = vector.broadcast %cst_81 : f32 to vector<2x256xf32>
    %c50 = arith.constant 50 : index
    %194 = memref.load %arg2[%c50] : memref<98xf32, #tpu.memory_space<smem>>
    %c1_82 = arith.constant 1 : index
    %c0_83 = arith.constant 0 : index
    %c1_84 = arith.constant 1 : index
    %195 = vector.load %arg5[%c1_82, %c0_83, %c1_84] : memref<2x2x358xf32, #tpu.memory_space<vmem>>, vector<1x2x256xf32>
    %196 = vector.shape_cast %195 : vector<1x2x256xf32> to vector<2x256xf32>
    %197 = vector.broadcast %194 : f32 to vector<2x256xf32>
    %198 = arith.mulf %197, %196 : vector<2x256xf32>
    %199 = arith.addf %193, %198 : vector<2x256xf32>
    %c57 = arith.constant 57 : index
    %200 = memref.load %arg2[%c57] : memref<98xf32, #tpu.memory_space<smem>>
    %c1_85 = arith.constant 1 : index
    %c0_86 = arith.constant 0 : index
    %c17_87 = arith.constant 17 : index
    %201 = vector.load %arg5[%c1_85, %c0_86, %c17_87] : memref<2x2x358xf32, #tpu.memory_space<vmem>>, vector<1x2x256xf32>
    %202 = vector.shape_cast %201 : vector<1x2x256xf32> to vector<2x256xf32>
    %203 = vector.broadcast %200 : f32 to vector<2x256xf32>
    %204 = arith.mulf %203, %202 : vector<2x256xf32>
    %205 = arith.addf %199, %204 : vector<2x256xf32>
    %c64_88 = arith.constant 64 : index
    %206 = memref.load %arg2[%c64_88] : memref<98xf32, #tpu.memory_space<smem>>
    %c1_89 = arith.constant 1 : index
    %c0_90 = arith.constant 0 : index
    %c33_91 = arith.constant 33 : index
    %207 = vector.load %arg5[%c1_89, %c0_90, %c33_91] : memref<2x2x358xf32, #tpu.memory_space<vmem>>, vector<1x2x256xf32>
    %208 = vector.shape_cast %207 : vector<1x2x256xf32> to vector<2x256xf32>
    %209 = vector.broadcast %206 : f32 to vector<2x256xf32>
    %210 = arith.mulf %209, %208 : vector<2x256xf32>
    %211 = arith.addf %205, %210 : vector<2x256xf32>
    %c71 = arith.constant 71 : index
    %212 = memref.load %arg2[%c71] : memref<98xf32, #tpu.memory_space<smem>>
    %c1_92 = arith.constant 1 : index
    %c0_93 = arith.constant 0 : index
    %c49_94 = arith.constant 49 : index
    %213 = vector.load %arg5[%c1_92, %c0_93, %c49_94] : memref<2x2x358xf32, #tpu.memory_space<vmem>>, vector<1x2x256xf32>
    %214 = vector.shape_cast %213 : vector<1x2x256xf32> to vector<2x256xf32>
    %215 = vector.broadcast %212 : f32 to vector<2x256xf32>
    %216 = arith.mulf %215, %214 : vector<2x256xf32>
    %217 = arith.addf %211, %216 : vector<2x256xf32>
    %c78 = arith.constant 78 : index
    %218 = memref.load %arg2[%c78] : memref<98xf32, #tpu.memory_space<smem>>
    %c1_95 = arith.constant 1 : index
    %c0_96 = arith.constant 0 : index
    %c65_97 = arith.constant 65 : index
    %219 = vector.load %arg5[%c1_95, %c0_96, %c65_97] : memref<2x2x358xf32, #tpu.memory_space<vmem>>, vector<1x2x256xf32>
    %220 = vector.shape_cast %219 : vector<1x2x256xf32> to vector<2x256xf32>
    %221 = vector.broadcast %218 : f32 to vector<2x256xf32>
    %222 = arith.mulf %221, %220 : vector<2x256xf32>
    %223 = arith.addf %217, %222 : vector<2x256xf32>
    %c85 = arith.constant 85 : index
    %224 = memref.load %arg2[%c85] : memref<98xf32, #tpu.memory_space<smem>>
    %c1_98 = arith.constant 1 : index
    %c0_99 = arith.constant 0 : index
    %c81_100 = arith.constant 81 : index
    %225 = vector.load %arg5[%c1_98, %c0_99, %c81_100] : memref<2x2x358xf32, #tpu.memory_space<vmem>>, vector<1x2x256xf32>
    %226 = vector.shape_cast %225 : vector<1x2x256xf32> to vector<2x256xf32>
    %227 = vector.broadcast %224 : f32 to vector<2x256xf32>
    %228 = arith.mulf %227, %226 : vector<2x256xf32>
    %229 = arith.addf %223, %228 : vector<2x256xf32>
    %c92 = arith.constant 92 : index
    %230 = memref.load %arg2[%c92] : memref<98xf32, #tpu.memory_space<smem>>
    %c1_101 = arith.constant 1 : index
    %c0_102 = arith.constant 0 : index
    %c97_103 = arith.constant 97 : index
    %231 = vector.load %arg5[%c1_101, %c0_102, %c97_103] : memref<2x2x358xf32, #tpu.memory_space<vmem>>, vector<1x2x256xf32>
    %232 = vector.shape_cast %231 : vector<1x2x256xf32> to vector<2x256xf32>
    %233 = vector.broadcast %230 : f32 to vector<2x256xf32>
    %234 = arith.mulf %233, %232 : vector<2x256xf32>
    %235 = arith.addf %229, %234 : vector<2x256xf32>
    %236 = vector.broadcast %146 : vector<1x256xf32> to vector<2x256xf32>
    %237 = arith.mulf %235, %236 : vector<2x256xf32>
    %238 = arith.addf %192, %237 : vector<2x256xf32>
    %c-1_i32 = arith.constant -1 : i32
    %239 = vector.broadcast %c-1_i32 : i32 to vector<1x256xi32>
    %240 = arith.addi %30, %239 : vector<1x256xi32>
    %c0_i32_104 = arith.constant 0 : i32
    %241 = vector.broadcast %c0_i32_104 : i32 to vector<1x256xi32>
    %242 = arith.cmpi sge, %240, %241 : vector<1x256xi32>
    %c-1_i32_105 = arith.constant -1 : i32
    %243 = vector.broadcast %c-1_i32_105 : i32 to vector<1x256xi32>
    %244 = arith.addi %30, %243 : vector<1x256xi32>
    %c16_i32_106 = arith.constant 16 : i32
    %245 = vector.broadcast %c16_i32_106 : i32 to vector<1x256xi32>
    %246 = arith.cmpi slt, %244, %245 : vector<1x256xi32>
    %247 = arith.andi %242, %246 : vector<1x256xi1>
    %248 = arith.extui %247 : vector<1x256xi1> to vector<1x256xi32>
    %249 = arith.sitofp %248 : vector<1x256xi32> to vector<1x256xf32>
    %cst_107 = arith.constant 0.000000e+00 : f32
    %250 = vector.broadcast %cst_107 : f32 to vector<2x256xf32>
    %c2 = arith.constant 2 : index
    %251 = memref.load %arg2[%c2] : memref<98xf32, #tpu.memory_space<smem>>
    %c0_108 = arith.constant 0 : index
    %c0_109 = arith.constant 0 : index
    %c2_110 = arith.constant 2 : index
    %252 = vector.load %arg5[%c0_108, %c0_109, %c2_110] : memref<2x2x358xf32, #tpu.memory_space<vmem>>, vector<1x2x256xf32>
    %253 = vector.shape_cast %252 : vector<1x2x256xf32> to vector<2x256xf32>
    %254 = vector.broadcast %251 : f32 to vector<2x256xf32>
    %255 = arith.mulf %254, %253 : vector<2x256xf32>
    %256 = arith.addf %250, %255 : vector<2x256xf32>
    %c9 = arith.constant 9 : index
    %257 = memref.load %arg2[%c9] : memref<98xf32, #tpu.memory_space<smem>>
    %c0_111 = arith.constant 0 : index
    %c0_112 = arith.constant 0 : index
    %c18 = arith.constant 18 : index
    %258 = vector.load %arg5[%c0_111, %c0_112, %c18] : memref<2x2x358xf32, #tpu.memory_space<vmem>>, vector<1x2x256xf32>
    %259 = vector.shape_cast %258 : vector<1x2x256xf32> to vector<2x256xf32>
    %260 = vector.broadcast %257 : f32 to vector<2x256xf32>
    %261 = arith.mulf %260, %259 : vector<2x256xf32>
    %262 = arith.addf %256, %261 : vector<2x256xf32>
    %c16_113 = arith.constant 16 : index
    %263 = memref.load %arg2[%c16_113] : memref<98xf32, #tpu.memory_space<smem>>
    %c0_114 = arith.constant 0 : index
    %c0_115 = arith.constant 0 : index
    %c34 = arith.constant 34 : index
    %264 = vector.load %arg5[%c0_114, %c0_115, %c34] : memref<2x2x358xf32, #tpu.memory_space<vmem>>, vector<1x2x256xf32>
    %265 = vector.shape_cast %264 : vector<1x2x256xf32> to vector<2x256xf32>
    %266 = vector.broadcast %263 : f32 to vector<2x256xf32>
    %267 = arith.mulf %266, %265 : vector<2x256xf32>
    %268 = arith.addf %262, %267 : vector<2x256xf32>
    %c23 = arith.constant 23 : index
    %269 = memref.load %arg2[%c23] : memref<98xf32, #tpu.memory_space<smem>>
    %c0_116 = arith.constant 0 : index
    %c0_117 = arith.constant 0 : index
    %c50_118 = arith.constant 50 : index
    %270 = vector.load %arg5[%c0_116, %c0_117, %c50_118] : memref<2x2x358xf32, #tpu.memory_space<vmem>>, vector<1x2x256xf32>
    %271 = vector.shape_cast %270 : vector<1x2x256xf32> to vector<2x256xf32>
    %272 = vector.broadcast %269 : f32 to vector<2x256xf32>
    %273 = arith.mulf %272, %271 : vector<2x256xf32>
    %274 = arith.addf %268, %273 : vector<2x256xf32>
    %c30 = arith.constant 30 : index
    %275 = memref.load %arg2[%c30] : memref<98xf32, #tpu.memory_space<smem>>
    %c0_119 = arith.constant 0 : index
    %c0_120 = arith.constant 0 : index
    %c66 = arith.constant 66 : index
    %276 = vector.load %arg5[%c0_119, %c0_120, %c66] : memref<2x2x358xf32, #tpu.memory_space<vmem>>, vector<1x2x256xf32>
    %277 = vector.shape_cast %276 : vector<1x2x256xf32> to vector<2x256xf32>
    %278 = vector.broadcast %275 : f32 to vector<2x256xf32>
    %279 = arith.mulf %278, %277 : vector<2x256xf32>
    %280 = arith.addf %274, %279 : vector<2x256xf32>
    %c37 = arith.constant 37 : index
    %281 = memref.load %arg2[%c37] : memref<98xf32, #tpu.memory_space<smem>>
    %c0_121 = arith.constant 0 : index
    %c0_122 = arith.constant 0 : index
    %c82 = arith.constant 82 : index
    %282 = vector.load %arg5[%c0_121, %c0_122, %c82] : memref<2x2x358xf32, #tpu.memory_space<vmem>>, vector<1x2x256xf32>
    %283 = vector.shape_cast %282 : vector<1x2x256xf32> to vector<2x256xf32>
    %284 = vector.broadcast %281 : f32 to vector<2x256xf32>
    %285 = arith.mulf %284, %283 : vector<2x256xf32>
    %286 = arith.addf %280, %285 : vector<2x256xf32>
    %c44 = arith.constant 44 : index
    %287 = memref.load %arg2[%c44] : memref<98xf32, #tpu.memory_space<smem>>
    %c0_123 = arith.constant 0 : index
    %c0_124 = arith.constant 0 : index
    %c98 = arith.constant 98 : index
    %288 = vector.load %arg5[%c0_123, %c0_124, %c98] : memref<2x2x358xf32, #tpu.memory_space<vmem>>, vector<1x2x256xf32>
    %289 = vector.shape_cast %288 : vector<1x2x256xf32> to vector<2x256xf32>
    %290 = vector.broadcast %287 : f32 to vector<2x256xf32>
    %291 = arith.mulf %290, %289 : vector<2x256xf32>
    %292 = arith.addf %286, %291 : vector<2x256xf32>
    %293 = vector.broadcast %249 : vector<1x256xf32> to vector<2x256xf32>
    %294 = arith.mulf %292, %293 : vector<2x256xf32>
    %295 = arith.addf %238, %294 : vector<2x256xf32>
    %cst_125 = arith.constant 0.000000e+00 : f32
    %296 = vector.broadcast %cst_125 : f32 to vector<2x256xf32>
    %c51_126 = arith.constant 51 : index
    %297 = memref.load %arg2[%c51_126] : memref<98xf32, #tpu.memory_space<smem>>
    %c1_127 = arith.constant 1 : index
    %c0_128 = arith.constant 0 : index
    %c2_129 = arith.constant 2 : index
    %298 = vector.load %arg5[%c1_127, %c0_128, %c2_129] : memref<2x2x358xf32, #tpu.memory_space<vmem>>, vector<1x2x256xf32>
    %299 = vector.shape_cast %298 : vector<1x2x256xf32> to vector<2x256xf32>
    %300 = vector.broadcast %297 : f32 to vector<2x256xf32>
    %301 = arith.mulf %300, %299 : vector<2x256xf32>
    %302 = arith.addf %296, %301 : vector<2x256xf32>
    %c58 = arith.constant 58 : index
    %303 = memref.load %arg2[%c58] : memref<98xf32, #tpu.memory_space<smem>>
    %c1_130 = arith.constant 1 : index
    %c0_131 = arith.constant 0 : index
    %c18_132 = arith.constant 18 : index
    %304 = vector.load %arg5[%c1_130, %c0_131, %c18_132] : memref<2x2x358xf32, #tpu.memory_space<vmem>>, vector<1x2x256xf32>
    %305 = vector.shape_cast %304 : vector<1x2x256xf32> to vector<2x256xf32>
    %306 = vector.broadcast %303 : f32 to vector<2x256xf32>
    %307 = arith.mulf %306, %305 : vector<2x256xf32>
    %308 = arith.addf %302, %307 : vector<2x256xf32>
    %c65_133 = arith.constant 65 : index
    %309 = memref.load %arg2[%c65_133] : memref<98xf32, #tpu.memory_space<smem>>
    %c1_134 = arith.constant 1 : index
    %c0_135 = arith.constant 0 : index
    %c34_136 = arith.constant 34 : index
    %310 = vector.load %arg5[%c1_134, %c0_135, %c34_136] : memref<2x2x358xf32, #tpu.memory_space<vmem>>, vector<1x2x256xf32>
    %311 = vector.shape_cast %310 : vector<1x2x256xf32> to vector<2x256xf32>
    %312 = vector.broadcast %309 : f32 to vector<2x256xf32>
    %313 = arith.mulf %312, %311 : vector<2x256xf32>
    %314 = arith.addf %308, %313 : vector<2x256xf32>
    %c72 = arith.constant 72 : index
    %315 = memref.load %arg2[%c72] : memref<98xf32, #tpu.memory_space<smem>>
    %c1_137 = arith.constant 1 : index
    %c0_138 = arith.constant 0 : index
    %c50_139 = arith.constant 50 : index
    %316 = vector.load %arg5[%c1_137, %c0_138, %c50_139] : memref<2x2x358xf32, #tpu.memory_space<vmem>>, vector<1x2x256xf32>
    %317 = vector.shape_cast %316 : vector<1x2x256xf32> to vector<2x256xf32>
    %318 = vector.broadcast %315 : f32 to vector<2x256xf32>
    %319 = arith.mulf %318, %317 : vector<2x256xf32>
    %320 = arith.addf %314, %319 : vector<2x256xf32>
    %c79 = arith.constant 79 : index
    %321 = memref.load %arg2[%c79] : memref<98xf32, #tpu.memory_space<smem>>
    %c1_140 = arith.constant 1 : index
    %c0_141 = arith.constant 0 : index
    %c66_142 = arith.constant 66 : index
    %322 = vector.load %arg5[%c1_140, %c0_141, %c66_142] : memref<2x2x358xf32, #tpu.memory_space<vmem>>, vector<1x2x256xf32>
    %323 = vector.shape_cast %322 : vector<1x2x256xf32> to vector<2x256xf32>
    %324 = vector.broadcast %321 : f32 to vector<2x256xf32>
    %325 = arith.mulf %324, %323 : vector<2x256xf32>
    %326 = arith.addf %320, %325 : vector<2x256xf32>
    %c86 = arith.constant 86 : index
    %327 = memref.load %arg2[%c86] : memref<98xf32, #tpu.memory_space<smem>>
    %c1_143 = arith.constant 1 : index
    %c0_144 = arith.constant 0 : index
    %c82_145 = arith.constant 82 : index
    %328 = vector.load %arg5[%c1_143, %c0_144, %c82_145] : memref<2x2x358xf32, #tpu.memory_space<vmem>>, vector<1x2x256xf32>
    %329 = vector.shape_cast %328 : vector<1x2x256xf32> to vector<2x256xf32>
    %330 = vector.broadcast %327 : f32 to vector<2x256xf32>
    %331 = arith.mulf %330, %329 : vector<2x256xf32>
    %332 = arith.addf %326, %331 : vector<2x256xf32>
    %c93 = arith.constant 93 : index
    %333 = memref.load %arg2[%c93] : memref<98xf32, #tpu.memory_space<smem>>
    %c1_146 = arith.constant 1 : index
    %c0_147 = arith.constant 0 : index
    %c98_148 = arith.constant 98 : index
    %334 = vector.load %arg5[%c1_146, %c0_147, %c98_148] : memref<2x2x358xf32, #tpu.memory_space<vmem>>, vector<1x2x256xf32>
    %335 = vector.shape_cast %334 : vector<1x2x256xf32> to vector<2x256xf32>
    %336 = vector.broadcast %333 : f32 to vector<2x256xf32>
    %337 = arith.mulf %336, %335 : vector<2x256xf32>
    %338 = arith.addf %332, %337 : vector<2x256xf32>
    %339 = vector.broadcast %249 : vector<1x256xf32> to vector<2x256xf32>
    %340 = arith.mulf %338, %339 : vector<2x256xf32>
    %341 = arith.addf %295, %340 : vector<2x256xf32>
    %c0_i32_149 = arith.constant 0 : i32
    %342 = vector.broadcast %c0_i32_149 : i32 to vector<1x256xi32>
    %343 = arith.addi %30, %342 : vector<1x256xi32>
    %c0_i32_150 = arith.constant 0 : i32
    %344 = vector.broadcast %c0_i32_150 : i32 to vector<1x256xi32>
    %345 = arith.cmpi sge, %343, %344 : vector<1x256xi32>
    %c0_i32_151 = arith.constant 0 : i32
    %346 = vector.broadcast %c0_i32_151 : i32 to vector<1x256xi32>
    %347 = arith.addi %30, %346 : vector<1x256xi32>
    %c16_i32_152 = arith.constant 16 : i32
    %348 = vector.broadcast %c16_i32_152 : i32 to vector<1x256xi32>
    %349 = arith.cmpi slt, %347, %348 : vector<1x256xi32>
    %350 = arith.andi %345, %349 : vector<1x256xi1>
    %351 = arith.extui %350 : vector<1x256xi1> to vector<1x256xi32>
    %352 = arith.sitofp %351 : vector<1x256xi32> to vector<1x256xf32>
    %cst_153 = arith.constant 0.000000e+00 : f32
    %353 = vector.broadcast %cst_153 : f32 to vector<2x256xf32>
    %c3 = arith.constant 3 : index
    %354 = memref.load %arg2[%c3] : memref<98xf32, #tpu.memory_space<smem>>
    %c0_154 = arith.constant 0 : index
    %c0_155 = arith.constant 0 : index
    %c3_156 = arith.constant 3 : index
    %355 = vector.load %arg5[%c0_154, %c0_155, %c3_156] : memref<2x2x358xf32, #tpu.memory_space<vmem>>, vector<1x2x256xf32>
    %356 = vector.shape_cast %355 : vector<1x2x256xf32> to vector<2x256xf32>
    %357 = vector.broadcast %354 : f32 to vector<2x256xf32>
    %358 = arith.mulf %357, %356 : vector<2x256xf32>
    %359 = arith.addf %353, %358 : vector<2x256xf32>
    %c10 = arith.constant 10 : index
    %360 = memref.load %arg2[%c10] : memref<98xf32, #tpu.memory_space<smem>>
    %c0_157 = arith.constant 0 : index
    %c0_158 = arith.constant 0 : index
    %c19 = arith.constant 19 : index
    %361 = vector.load %arg5[%c0_157, %c0_158, %c19] : memref<2x2x358xf32, #tpu.memory_space<vmem>>, vector<1x2x256xf32>
    %362 = vector.shape_cast %361 : vector<1x2x256xf32> to vector<2x256xf32>
    %363 = vector.broadcast %360 : f32 to vector<2x256xf32>
    %364 = arith.mulf %363, %362 : vector<2x256xf32>
    %365 = arith.addf %359, %364 : vector<2x256xf32>
    %c17_159 = arith.constant 17 : index
    %366 = memref.load %arg2[%c17_159] : memref<98xf32, #tpu.memory_space<smem>>
    %c0_160 = arith.constant 0 : index
    %c0_161 = arith.constant 0 : index
    %c35_162 = arith.constant 35 : index
    %367 = vector.load %arg5[%c0_160, %c0_161, %c35_162] : memref<2x2x358xf32, #tpu.memory_space<vmem>>, vector<1x2x256xf32>
    %368 = vector.shape_cast %367 : vector<1x2x256xf32> to vector<2x256xf32>
    %369 = vector.broadcast %366 : f32 to vector<2x256xf32>
    %370 = arith.mulf %369, %368 : vector<2x256xf32>
    %371 = arith.addf %365, %370 : vector<2x256xf32>
    %c24 = arith.constant 24 : index
    %372 = memref.load %arg2[%c24] : memref<98xf32, #tpu.memory_space<smem>>
    %c0_163 = arith.constant 0 : index
    %c0_164 = arith.constant 0 : index
    %c51_165 = arith.constant 51 : index
    %373 = vector.load %arg5[%c0_163, %c0_164, %c51_165] : memref<2x2x358xf32, #tpu.memory_space<vmem>>, vector<1x2x256xf32>
    %374 = vector.shape_cast %373 : vector<1x2x256xf32> to vector<2x256xf32>
    %375 = vector.broadcast %372 : f32 to vector<2x256xf32>
    %376 = arith.mulf %375, %374 : vector<2x256xf32>
    %377 = arith.addf %371, %376 : vector<2x256xf32>
    %c31 = arith.constant 31 : index
    %378 = memref.load %arg2[%c31] : memref<98xf32, #tpu.memory_space<smem>>
    %c0_166 = arith.constant 0 : index
    %c0_167 = arith.constant 0 : index
    %c67 = arith.constant 67 : index
    %379 = vector.load %arg5[%c0_166, %c0_167, %c67] : memref<2x2x358xf32, #tpu.memory_space<vmem>>, vector<1x2x256xf32>
    %380 = vector.shape_cast %379 : vector<1x2x256xf32> to vector<2x256xf32>
    %381 = vector.broadcast %378 : f32 to vector<2x256xf32>
    %382 = arith.mulf %381, %380 : vector<2x256xf32>
    %383 = arith.addf %377, %382 : vector<2x256xf32>
    %c38 = arith.constant 38 : index
    %384 = memref.load %arg2[%c38] : memref<98xf32, #tpu.memory_space<smem>>
    %c0_168 = arith.constant 0 : index
    %c0_169 = arith.constant 0 : index
    %c83 = arith.constant 83 : index
    %385 = vector.load %arg5[%c0_168, %c0_169, %c83] : memref<2x2x358xf32, #tpu.memory_space<vmem>>, vector<1x2x256xf32>
    %386 = vector.shape_cast %385 : vector<1x2x256xf32> to vector<2x256xf32>
    %387 = vector.broadcast %384 : f32 to vector<2x256xf32>
    %388 = arith.mulf %387, %386 : vector<2x256xf32>
    %389 = arith.addf %383, %388 : vector<2x256xf32>
    %c45 = arith.constant 45 : index
    %390 = memref.load %arg2[%c45] : memref<98xf32, #tpu.memory_space<smem>>
    %c0_170 = arith.constant 0 : index
    %c0_171 = arith.constant 0 : index
    %c99 = arith.constant 99 : index
    %391 = vector.load %arg5[%c0_170, %c0_171, %c99] : memref<2x2x358xf32, #tpu.memory_space<vmem>>, vector<1x2x256xf32>
    %392 = vector.shape_cast %391 : vector<1x2x256xf32> to vector<2x256xf32>
    %393 = vector.broadcast %390 : f32 to vector<2x256xf32>
    %394 = arith.mulf %393, %392 : vector<2x256xf32>
    %395 = arith.addf %389, %394 : vector<2x256xf32>
    %396 = vector.broadcast %352 : vector<1x256xf32> to vector<2x256xf32>
    %397 = arith.mulf %395, %396 : vector<2x256xf32>
    %398 = arith.addf %341, %397 : vector<2x256xf32>
    %cst_172 = arith.constant 0.000000e+00 : f32
    %399 = vector.broadcast %cst_172 : f32 to vector<2x256xf32>
    %c52 = arith.constant 52 : index
    %400 = memref.load %arg2[%c52] : memref<98xf32, #tpu.memory_space<smem>>
    %c1_173 = arith.constant 1 : index
    %c0_174 = arith.constant 0 : index
    %c3_175 = arith.constant 3 : index
    %401 = vector.load %arg5[%c1_173, %c0_174, %c3_175] : memref<2x2x358xf32, #tpu.memory_space<vmem>>, vector<1x2x256xf32>
    %402 = vector.shape_cast %401 : vector<1x2x256xf32> to vector<2x256xf32>
    %403 = vector.broadcast %400 : f32 to vector<2x256xf32>
    %404 = arith.mulf %403, %402 : vector<2x256xf32>
    %405 = arith.addf %399, %404 : vector<2x256xf32>
    %c59 = arith.constant 59 : index
    %406 = memref.load %arg2[%c59] : memref<98xf32, #tpu.memory_space<smem>>
    %c1_176 = arith.constant 1 : index
    %c0_177 = arith.constant 0 : index
    %c19_178 = arith.constant 19 : index
    %407 = vector.load %arg5[%c1_176, %c0_177, %c19_178] : memref<2x2x358xf32, #tpu.memory_space<vmem>>, vector<1x2x256xf32>
    %408 = vector.shape_cast %407 : vector<1x2x256xf32> to vector<2x256xf32>
    %409 = vector.broadcast %406 : f32 to vector<2x256xf32>
    %410 = arith.mulf %409, %408 : vector<2x256xf32>
    %411 = arith.addf %405, %410 : vector<2x256xf32>
    %c66_179 = arith.constant 66 : index
    %412 = memref.load %arg2[%c66_179] : memref<98xf32, #tpu.memory_space<smem>>
    %c1_180 = arith.constant 1 : index
    %c0_181 = arith.constant 0 : index
    %c35_182 = arith.constant 35 : index
    %413 = vector.load %arg5[%c1_180, %c0_181, %c35_182] : memref<2x2x358xf32, #tpu.memory_space<vmem>>, vector<1x2x256xf32>
    %414 = vector.shape_cast %413 : vector<1x2x256xf32> to vector<2x256xf32>
    %415 = vector.broadcast %412 : f32 to vector<2x256xf32>
    %416 = arith.mulf %415, %414 : vector<2x256xf32>
    %417 = arith.addf %411, %416 : vector<2x256xf32>
    %c73 = arith.constant 73 : index
    %418 = memref.load %arg2[%c73] : memref<98xf32, #tpu.memory_space<smem>>
    %c1_183 = arith.constant 1 : index
    %c0_184 = arith.constant 0 : index
    %c51_185 = arith.constant 51 : index
    %419 = vector.load %arg5[%c1_183, %c0_184, %c51_185] : memref<2x2x358xf32, #tpu.memory_space<vmem>>, vector<1x2x256xf32>
    %420 = vector.shape_cast %419 : vector<1x2x256xf32> to vector<2x256xf32>
    %421 = vector.broadcast %418 : f32 to vector<2x256xf32>
    %422 = arith.mulf %421, %420 : vector<2x256xf32>
    %423 = arith.addf %417, %422 : vector<2x256xf32>
    %c80_186 = arith.constant 80 : index
    %424 = memref.load %arg2[%c80_186] : memref<98xf32, #tpu.memory_space<smem>>
    %c1_187 = arith.constant 1 : index
    %c0_188 = arith.constant 0 : index
    %c67_189 = arith.constant 67 : index
    %425 = vector.load %arg5[%c1_187, %c0_188, %c67_189] : memref<2x2x358xf32, #tpu.memory_space<vmem>>, vector<1x2x256xf32>
    %426 = vector.shape_cast %425 : vector<1x2x256xf32> to vector<2x256xf32>
    %427 = vector.broadcast %424 : f32 to vector<2x256xf32>
    %428 = arith.mulf %427, %426 : vector<2x256xf32>
    %429 = arith.addf %423, %428 : vector<2x256xf32>
    %c87 = arith.constant 87 : index
    %430 = memref.load %arg2[%c87] : memref<98xf32, #tpu.memory_space<smem>>
    %c1_190 = arith.constant 1 : index
    %c0_191 = arith.constant 0 : index
    %c83_192 = arith.constant 83 : index
    %431 = vector.load %arg5[%c1_190, %c0_191, %c83_192] : memref<2x2x358xf32, #tpu.memory_space<vmem>>, vector<1x2x256xf32>
    %432 = vector.shape_cast %431 : vector<1x2x256xf32> to vector<2x256xf32>
    %433 = vector.broadcast %430 : f32 to vector<2x256xf32>
    %434 = arith.mulf %433, %432 : vector<2x256xf32>
    %435 = arith.addf %429, %434 : vector<2x256xf32>
    %c94 = arith.constant 94 : index
    %436 = memref.load %arg2[%c94] : memref<98xf32, #tpu.memory_space<smem>>
    %c1_193 = arith.constant 1 : index
    %c0_194 = arith.constant 0 : index
    %c99_195 = arith.constant 99 : index
    %437 = vector.load %arg5[%c1_193, %c0_194, %c99_195] : memref<2x2x358xf32, #tpu.memory_space<vmem>>, vector<1x2x256xf32>
    %438 = vector.shape_cast %437 : vector<1x2x256xf32> to vector<2x256xf32>
    %439 = vector.broadcast %436 : f32 to vector<2x256xf32>
    %440 = arith.mulf %439, %438 : vector<2x256xf32>
    %441 = arith.addf %435, %440 : vector<2x256xf32>
    %442 = vector.broadcast %352 : vector<1x256xf32> to vector<2x256xf32>
    %443 = arith.mulf %441, %442 : vector<2x256xf32>
    %444 = arith.addf %398, %443 : vector<2x256xf32>
    %c1_i32_196 = arith.constant 1 : i32
    %445 = vector.broadcast %c1_i32_196 : i32 to vector<1x256xi32>
    %446 = arith.addi %30, %445 : vector<1x256xi32>
    %c0_i32_197 = arith.constant 0 : i32
    %447 = vector.broadcast %c0_i32_197 : i32 to vector<1x256xi32>
    %448 = arith.cmpi sge, %446, %447 : vector<1x256xi32>
    %c1_i32_198 = arith.constant 1 : i32
    %449 = vector.broadcast %c1_i32_198 : i32 to vector<1x256xi32>
    %450 = arith.addi %30, %449 : vector<1x256xi32>
    %c16_i32_199 = arith.constant 16 : i32
    %451 = vector.broadcast %c16_i32_199 : i32 to vector<1x256xi32>
    %452 = arith.cmpi slt, %450, %451 : vector<1x256xi32>
    %453 = arith.andi %448, %452 : vector<1x256xi1>
    %454 = arith.extui %453 : vector<1x256xi1> to vector<1x256xi32>
    %455 = arith.sitofp %454 : vector<1x256xi32> to vector<1x256xf32>
    %cst_200 = arith.constant 0.000000e+00 : f32
    %456 = vector.broadcast %cst_200 : f32 to vector<2x256xf32>
    %c4 = arith.constant 4 : index
    %457 = memref.load %arg2[%c4] : memref<98xf32, #tpu.memory_space<smem>>
    %c0_201 = arith.constant 0 : index
    %c0_202 = arith.constant 0 : index
    %c4_203 = arith.constant 4 : index
    %458 = vector.load %arg5[%c0_201, %c0_202, %c4_203] : memref<2x2x358xf32, #tpu.memory_space<vmem>>, vector<1x2x256xf32>
    %459 = vector.shape_cast %458 : vector<1x2x256xf32> to vector<2x256xf32>
    %460 = vector.broadcast %457 : f32 to vector<2x256xf32>
    %461 = arith.mulf %460, %459 : vector<2x256xf32>
    %462 = arith.addf %456, %461 : vector<2x256xf32>
    %c11 = arith.constant 11 : index
    %463 = memref.load %arg2[%c11] : memref<98xf32, #tpu.memory_space<smem>>
    %c0_204 = arith.constant 0 : index
    %c0_205 = arith.constant 0 : index
    %c20 = arith.constant 20 : index
    %464 = vector.load %arg5[%c0_204, %c0_205, %c20] : memref<2x2x358xf32, #tpu.memory_space<vmem>>, vector<1x2x256xf32>
    %465 = vector.shape_cast %464 : vector<1x2x256xf32> to vector<2x256xf32>
    %466 = vector.broadcast %463 : f32 to vector<2x256xf32>
    %467 = arith.mulf %466, %465 : vector<2x256xf32>
    %468 = arith.addf %462, %467 : vector<2x256xf32>
    %c18_206 = arith.constant 18 : index
    %469 = memref.load %arg2[%c18_206] : memref<98xf32, #tpu.memory_space<smem>>
    %c0_207 = arith.constant 0 : index
    %c0_208 = arith.constant 0 : index
    %c36_209 = arith.constant 36 : index
    %470 = vector.load %arg5[%c0_207, %c0_208, %c36_209] : memref<2x2x358xf32, #tpu.memory_space<vmem>>, vector<1x2x256xf32>
    %471 = vector.shape_cast %470 : vector<1x2x256xf32> to vector<2x256xf32>
    %472 = vector.broadcast %469 : f32 to vector<2x256xf32>
    %473 = arith.mulf %472, %471 : vector<2x256xf32>
    %474 = arith.addf %468, %473 : vector<2x256xf32>
    %c25 = arith.constant 25 : index
    %475 = memref.load %arg2[%c25] : memref<98xf32, #tpu.memory_space<smem>>
    %c0_210 = arith.constant 0 : index
    %c0_211 = arith.constant 0 : index
    %c52_212 = arith.constant 52 : index
    %476 = vector.load %arg5[%c0_210, %c0_211, %c52_212] : memref<2x2x358xf32, #tpu.memory_space<vmem>>, vector<1x2x256xf32>
    %477 = vector.shape_cast %476 : vector<1x2x256xf32> to vector<2x256xf32>
    %478 = vector.broadcast %475 : f32 to vector<2x256xf32>
    %479 = arith.mulf %478, %477 : vector<2x256xf32>
    %480 = arith.addf %474, %479 : vector<2x256xf32>
    %c32_213 = arith.constant 32 : index
    %481 = memref.load %arg2[%c32_213] : memref<98xf32, #tpu.memory_space<smem>>
    %c0_214 = arith.constant 0 : index
    %c0_215 = arith.constant 0 : index
    %c68 = arith.constant 68 : index
    %482 = vector.load %arg5[%c0_214, %c0_215, %c68] : memref<2x2x358xf32, #tpu.memory_space<vmem>>, vector<1x2x256xf32>
    %483 = vector.shape_cast %482 : vector<1x2x256xf32> to vector<2x256xf32>
    %484 = vector.broadcast %481 : f32 to vector<2x256xf32>
    %485 = arith.mulf %484, %483 : vector<2x256xf32>
    %486 = arith.addf %480, %485 : vector<2x256xf32>
    %c39 = arith.constant 39 : index
    %487 = memref.load %arg2[%c39] : memref<98xf32, #tpu.memory_space<smem>>
    %c0_216 = arith.constant 0 : index
    %c0_217 = arith.constant 0 : index
    %c84_218 = arith.constant 84 : index
    %488 = vector.load %arg5[%c0_216, %c0_217, %c84_218] : memref<2x2x358xf32, #tpu.memory_space<vmem>>, vector<1x2x256xf32>
    %489 = vector.shape_cast %488 : vector<1x2x256xf32> to vector<2x256xf32>
    %490 = vector.broadcast %487 : f32 to vector<2x256xf32>
    %491 = arith.mulf %490, %489 : vector<2x256xf32>
    %492 = arith.addf %486, %491 : vector<2x256xf32>
    %c46 = arith.constant 46 : index
    %493 = memref.load %arg2[%c46] : memref<98xf32, #tpu.memory_space<smem>>
    %c0_219 = arith.constant 0 : index
    %c0_220 = arith.constant 0 : index
    %c100 = arith.constant 100 : index
    %494 = vector.load %arg5[%c0_219, %c0_220, %c100] : memref<2x2x358xf32, #tpu.memory_space<vmem>>, vector<1x2x256xf32>
    %495 = vector.shape_cast %494 : vector<1x2x256xf32> to vector<2x256xf32>
    %496 = vector.broadcast %493 : f32 to vector<2x256xf32>
    %497 = arith.mulf %496, %495 : vector<2x256xf32>
    %498 = arith.addf %492, %497 : vector<2x256xf32>
    %499 = vector.broadcast %455 : vector<1x256xf32> to vector<2x256xf32>
    %500 = arith.mulf %498, %499 : vector<2x256xf32>
    %501 = arith.addf %444, %500 : vector<2x256xf32>
    %cst_221 = arith.constant 0.000000e+00 : f32
    %502 = vector.broadcast %cst_221 : f32 to vector<2x256xf32>
    %c53 = arith.constant 53 : index
    %503 = memref.load %arg2[%c53] : memref<98xf32, #tpu.memory_space<smem>>
    %c1_222 = arith.constant 1 : index
    %c0_223 = arith.constant 0 : index
    %c4_224 = arith.constant 4 : index
    %504 = vector.load %arg5[%c1_222, %c0_223, %c4_224] : memref<2x2x358xf32, #tpu.memory_space<vmem>>, vector<1x2x256xf32>
    %505 = vector.shape_cast %504 : vector<1x2x256xf32> to vector<2x256xf32>
    %506 = vector.broadcast %503 : f32 to vector<2x256xf32>
    %507 = arith.mulf %506, %505 : vector<2x256xf32>
    %508 = arith.addf %502, %507 : vector<2x256xf32>
    %c60 = arith.constant 60 : index
    %509 = memref.load %arg2[%c60] : memref<98xf32, #tpu.memory_space<smem>>
    %c1_225 = arith.constant 1 : index
    %c0_226 = arith.constant 0 : index
    %c20_227 = arith.constant 20 : index
    %510 = vector.load %arg5[%c1_225, %c0_226, %c20_227] : memref<2x2x358xf32, #tpu.memory_space<vmem>>, vector<1x2x256xf32>
    %511 = vector.shape_cast %510 : vector<1x2x256xf32> to vector<2x256xf32>
    %512 = vector.broadcast %509 : f32 to vector<2x256xf32>
    %513 = arith.mulf %512, %511 : vector<2x256xf32>
    %514 = arith.addf %508, %513 : vector<2x256xf32>
    %c67_228 = arith.constant 67 : index
    %515 = memref.load %arg2[%c67_228] : memref<98xf32, #tpu.memory_space<smem>>
    %c1_229 = arith.constant 1 : index
    %c0_230 = arith.constant 0 : index
    %c36_231 = arith.constant 36 : index
    %516 = vector.load %arg5[%c1_229, %c0_230, %c36_231] : memref<2x2x358xf32, #tpu.memory_space<vmem>>, vector<1x2x256xf32>
    %517 = vector.shape_cast %516 : vector<1x2x256xf32> to vector<2x256xf32>
    %518 = vector.broadcast %515 : f32 to vector<2x256xf32>
    %519 = arith.mulf %518, %517 : vector<2x256xf32>
    %520 = arith.addf %514, %519 : vector<2x256xf32>
    %c74 = arith.constant 74 : index
    %521 = memref.load %arg2[%c74] : memref<98xf32, #tpu.memory_space<smem>>
    %c1_232 = arith.constant 1 : index
    %c0_233 = arith.constant 0 : index
    %c52_234 = arith.constant 52 : index
    %522 = vector.load %arg5[%c1_232, %c0_233, %c52_234] : memref<2x2x358xf32, #tpu.memory_space<vmem>>, vector<1x2x256xf32>
    %523 = vector.shape_cast %522 : vector<1x2x256xf32> to vector<2x256xf32>
    %524 = vector.broadcast %521 : f32 to vector<2x256xf32>
    %525 = arith.mulf %524, %523 : vector<2x256xf32>
    %526 = arith.addf %520, %525 : vector<2x256xf32>
    %c81_235 = arith.constant 81 : index
    %527 = memref.load %arg2[%c81_235] : memref<98xf32, #tpu.memory_space<smem>>
    %c1_236 = arith.constant 1 : index
    %c0_237 = arith.constant 0 : index
    %c68_238 = arith.constant 68 : index
    %528 = vector.load %arg5[%c1_236, %c0_237, %c68_238] : memref<2x2x358xf32, #tpu.memory_space<vmem>>, vector<1x2x256xf32>
    %529 = vector.shape_cast %528 : vector<1x2x256xf32> to vector<2x256xf32>
    %530 = vector.broadcast %527 : f32 to vector<2x256xf32>
    %531 = arith.mulf %530, %529 : vector<2x256xf32>
    %532 = arith.addf %526, %531 : vector<2x256xf32>
    %c88 = arith.constant 88 : index
    %533 = memref.load %arg2[%c88] : memref<98xf32, #tpu.memory_space<smem>>
    %c1_239 = arith.constant 1 : index
    %c0_240 = arith.constant 0 : index
    %c84_241 = arith.constant 84 : index
    %534 = vector.load %arg5[%c1_239, %c0_240, %c84_241] : memref<2x2x358xf32, #tpu.memory_space<vmem>>, vector<1x2x256xf32>
    %535 = vector.shape_cast %534 : vector<1x2x256xf32> to vector<2x256xf32>
    %536 = vector.broadcast %533 : f32 to vector<2x256xf32>
    %537 = arith.mulf %536, %535 : vector<2x256xf32>
    %538 = arith.addf %532, %537 : vector<2x256xf32>
    %c95 = arith.constant 95 : index
    %539 = memref.load %arg2[%c95] : memref<98xf32, #tpu.memory_space<smem>>
    %c1_242 = arith.constant 1 : index
    %c0_243 = arith.constant 0 : index
    %c100_244 = arith.constant 100 : index
    %540 = vector.load %arg5[%c1_242, %c0_243, %c100_244] : memref<2x2x358xf32, #tpu.memory_space<vmem>>, vector<1x2x256xf32>
    %541 = vector.shape_cast %540 : vector<1x2x256xf32> to vector<2x256xf32>
    %542 = vector.broadcast %539 : f32 to vector<2x256xf32>
    %543 = arith.mulf %542, %541 : vector<2x256xf32>
    %544 = arith.addf %538, %543 : vector<2x256xf32>
    %545 = vector.broadcast %455 : vector<1x256xf32> to vector<2x256xf32>
    %546 = arith.mulf %544, %545 : vector<2x256xf32>
    %547 = arith.addf %501, %546 : vector<2x256xf32>
    %c2_i32 = arith.constant 2 : i32
    %548 = vector.broadcast %c2_i32 : i32 to vector<1x256xi32>
    %549 = arith.addi %30, %548 : vector<1x256xi32>
    %c0_i32_245 = arith.constant 0 : i32
    %550 = vector.broadcast %c0_i32_245 : i32 to vector<1x256xi32>
    %551 = arith.cmpi sge, %549, %550 : vector<1x256xi32>
    %c2_i32_246 = arith.constant 2 : i32
    %552 = vector.broadcast %c2_i32_246 : i32 to vector<1x256xi32>
    %553 = arith.addi %30, %552 : vector<1x256xi32>
    %c16_i32_247 = arith.constant 16 : i32
    %554 = vector.broadcast %c16_i32_247 : i32 to vector<1x256xi32>
    %555 = arith.cmpi slt, %553, %554 : vector<1x256xi32>
    %556 = arith.andi %551, %555 : vector<1x256xi1>
    %557 = arith.extui %556 : vector<1x256xi1> to vector<1x256xi32>
    %558 = arith.sitofp %557 : vector<1x256xi32> to vector<1x256xf32>
    %cst_248 = arith.constant 0.000000e+00 : f32
    %559 = vector.broadcast %cst_248 : f32 to vector<2x256xf32>
    %c5 = arith.constant 5 : index
    %560 = memref.load %arg2[%c5] : memref<98xf32, #tpu.memory_space<smem>>
    %c0_249 = arith.constant 0 : index
    %c0_250 = arith.constant 0 : index
    %c5_251 = arith.constant 5 : index
    %561 = vector.load %arg5[%c0_249, %c0_250, %c5_251] : memref<2x2x358xf32, #tpu.memory_space<vmem>>, vector<1x2x256xf32>
    %562 = vector.shape_cast %561 : vector<1x2x256xf32> to vector<2x256xf32>
    %563 = vector.broadcast %560 : f32 to vector<2x256xf32>
    %564 = arith.mulf %563, %562 : vector<2x256xf32>
    %565 = arith.addf %559, %564 : vector<2x256xf32>
    %c12 = arith.constant 12 : index
    %566 = memref.load %arg2[%c12] : memref<98xf32, #tpu.memory_space<smem>>
    %c0_252 = arith.constant 0 : index
    %c0_253 = arith.constant 0 : index
    %c21_254 = arith.constant 21 : index
    %567 = vector.load %arg5[%c0_252, %c0_253, %c21_254] : memref<2x2x358xf32, #tpu.memory_space<vmem>>, vector<1x2x256xf32>
    %568 = vector.shape_cast %567 : vector<1x2x256xf32> to vector<2x256xf32>
    %569 = vector.broadcast %566 : f32 to vector<2x256xf32>
    %570 = arith.mulf %569, %568 : vector<2x256xf32>
    %571 = arith.addf %565, %570 : vector<2x256xf32>
    %c19_255 = arith.constant 19 : index
    %572 = memref.load %arg2[%c19_255] : memref<98xf32, #tpu.memory_space<smem>>
    %c0_256 = arith.constant 0 : index
    %c0_257 = arith.constant 0 : index
    %c37_258 = arith.constant 37 : index
    %573 = vector.load %arg5[%c0_256, %c0_257, %c37_258] : memref<2x2x358xf32, #tpu.memory_space<vmem>>, vector<1x2x256xf32>
    %574 = vector.shape_cast %573 : vector<1x2x256xf32> to vector<2x256xf32>
    %575 = vector.broadcast %572 : f32 to vector<2x256xf32>
    %576 = arith.mulf %575, %574 : vector<2x256xf32>
    %577 = arith.addf %571, %576 : vector<2x256xf32>
    %c26 = arith.constant 26 : index
    %578 = memref.load %arg2[%c26] : memref<98xf32, #tpu.memory_space<smem>>
    %c0_259 = arith.constant 0 : index
    %c0_260 = arith.constant 0 : index
    %c53_261 = arith.constant 53 : index
    %579 = vector.load %arg5[%c0_259, %c0_260, %c53_261] : memref<2x2x358xf32, #tpu.memory_space<vmem>>, vector<1x2x256xf32>
    %580 = vector.shape_cast %579 : vector<1x2x256xf32> to vector<2x256xf32>
    %581 = vector.broadcast %578 : f32 to vector<2x256xf32>
    %582 = arith.mulf %581, %580 : vector<2x256xf32>
    %583 = arith.addf %577, %582 : vector<2x256xf32>
    %c33_262 = arith.constant 33 : index
    %584 = memref.load %arg2[%c33_262] : memref<98xf32, #tpu.memory_space<smem>>
    %c0_263 = arith.constant 0 : index
    %c0_264 = arith.constant 0 : index
    %c69 = arith.constant 69 : index
    %585 = vector.load %arg5[%c0_263, %c0_264, %c69] : memref<2x2x358xf32, #tpu.memory_space<vmem>>, vector<1x2x256xf32>
    %586 = vector.shape_cast %585 : vector<1x2x256xf32> to vector<2x256xf32>
    %587 = vector.broadcast %584 : f32 to vector<2x256xf32>
    %588 = arith.mulf %587, %586 : vector<2x256xf32>
    %589 = arith.addf %583, %588 : vector<2x256xf32>
    %c40 = arith.constant 40 : index
    %590 = memref.load %arg2[%c40] : memref<98xf32, #tpu.memory_space<smem>>
    %c0_265 = arith.constant 0 : index
    %c0_266 = arith.constant 0 : index
    %c85_267 = arith.constant 85 : index
    %591 = vector.load %arg5[%c0_265, %c0_266, %c85_267] : memref<2x2x358xf32, #tpu.memory_space<vmem>>, vector<1x2x256xf32>
    %592 = vector.shape_cast %591 : vector<1x2x256xf32> to vector<2x256xf32>
    %593 = vector.broadcast %590 : f32 to vector<2x256xf32>
    %594 = arith.mulf %593, %592 : vector<2x256xf32>
    %595 = arith.addf %589, %594 : vector<2x256xf32>
    %c47 = arith.constant 47 : index
    %596 = memref.load %arg2[%c47] : memref<98xf32, #tpu.memory_space<smem>>
    %c0_268 = arith.constant 0 : index
    %c0_269 = arith.constant 0 : index
    %c101 = arith.constant 101 : index
    %597 = vector.load %arg5[%c0_268, %c0_269, %c101] : memref<2x2x358xf32, #tpu.memory_space<vmem>>, vector<1x2x256xf32>
    %598 = vector.shape_cast %597 : vector<1x2x256xf32> to vector<2x256xf32>
    %599 = vector.broadcast %596 : f32 to vector<2x256xf32>
    %600 = arith.mulf %599, %598 : vector<2x256xf32>
    %601 = arith.addf %595, %600 : vector<2x256xf32>
    %602 = vector.broadcast %558 : vector<1x256xf32> to vector<2x256xf32>
    %603 = arith.mulf %601, %602 : vector<2x256xf32>
    %604 = arith.addf %547, %603 : vector<2x256xf32>
    %cst_270 = arith.constant 0.000000e+00 : f32
    %605 = vector.broadcast %cst_270 : f32 to vector<2x256xf32>
    %c54 = arith.constant 54 : index
    %606 = memref.load %arg2[%c54] : memref<98xf32, #tpu.memory_space<smem>>
    %c1_271 = arith.constant 1 : index
    %c0_272 = arith.constant 0 : index
    %c5_273 = arith.constant 5 : index
    %607 = vector.load %arg5[%c1_271, %c0_272, %c5_273] : memref<2x2x358xf32, #tpu.memory_space<vmem>>, vector<1x2x256xf32>
    %608 = vector.shape_cast %607 : vector<1x2x256xf32> to vector<2x256xf32>
    %609 = vector.broadcast %606 : f32 to vector<2x256xf32>
    %610 = arith.mulf %609, %608 : vector<2x256xf32>
    %611 = arith.addf %605, %610 : vector<2x256xf32>
    %c61 = arith.constant 61 : index
    %612 = memref.load %arg2[%c61] : memref<98xf32, #tpu.memory_space<smem>>
    %c1_274 = arith.constant 1 : index
    %c0_275 = arith.constant 0 : index
    %c21_276 = arith.constant 21 : index
    %613 = vector.load %arg5[%c1_274, %c0_275, %c21_276] : memref<2x2x358xf32, #tpu.memory_space<vmem>>, vector<1x2x256xf32>
    %614 = vector.shape_cast %613 : vector<1x2x256xf32> to vector<2x256xf32>
    %615 = vector.broadcast %612 : f32 to vector<2x256xf32>
    %616 = arith.mulf %615, %614 : vector<2x256xf32>
    %617 = arith.addf %611, %616 : vector<2x256xf32>
    %c68_277 = arith.constant 68 : index
    %618 = memref.load %arg2[%c68_277] : memref<98xf32, #tpu.memory_space<smem>>
    %c1_278 = arith.constant 1 : index
    %c0_279 = arith.constant 0 : index
    %c37_280 = arith.constant 37 : index
    %619 = vector.load %arg5[%c1_278, %c0_279, %c37_280] : memref<2x2x358xf32, #tpu.memory_space<vmem>>, vector<1x2x256xf32>
    %620 = vector.shape_cast %619 : vector<1x2x256xf32> to vector<2x256xf32>
    %621 = vector.broadcast %618 : f32 to vector<2x256xf32>
    %622 = arith.mulf %621, %620 : vector<2x256xf32>
    %623 = arith.addf %617, %622 : vector<2x256xf32>
    %c75 = arith.constant 75 : index
    %624 = memref.load %arg2[%c75] : memref<98xf32, #tpu.memory_space<smem>>
    %c1_281 = arith.constant 1 : index
    %c0_282 = arith.constant 0 : index
    %c53_283 = arith.constant 53 : index
    %625 = vector.load %arg5[%c1_281, %c0_282, %c53_283] : memref<2x2x358xf32, #tpu.memory_space<vmem>>, vector<1x2x256xf32>
    %626 = vector.shape_cast %625 : vector<1x2x256xf32> to vector<2x256xf32>
    %627 = vector.broadcast %624 : f32 to vector<2x256xf32>
    %628 = arith.mulf %627, %626 : vector<2x256xf32>
    %629 = arith.addf %623, %628 : vector<2x256xf32>
    %c82_284 = arith.constant 82 : index
    %630 = memref.load %arg2[%c82_284] : memref<98xf32, #tpu.memory_space<smem>>
    %c1_285 = arith.constant 1 : index
    %c0_286 = arith.constant 0 : index
    %c69_287 = arith.constant 69 : index
    %631 = vector.load %arg5[%c1_285, %c0_286, %c69_287] : memref<2x2x358xf32, #tpu.memory_space<vmem>>, vector<1x2x256xf32>
    %632 = vector.shape_cast %631 : vector<1x2x256xf32> to vector<2x256xf32>
    %633 = vector.broadcast %630 : f32 to vector<2x256xf32>
    %634 = arith.mulf %633, %632 : vector<2x256xf32>
    %635 = arith.addf %629, %634 : vector<2x256xf32>
    %c89 = arith.constant 89 : index
    %636 = memref.load %arg2[%c89] : memref<98xf32, #tpu.memory_space<smem>>
    %c1_288 = arith.constant 1 : index
    %c0_289 = arith.constant 0 : index
    %c85_290 = arith.constant 85 : index
    %637 = vector.load %arg5[%c1_288, %c0_289, %c85_290] : memref<2x2x358xf32, #tpu.memory_space<vmem>>, vector<1x2x256xf32>
    %638 = vector.shape_cast %637 : vector<1x2x256xf32> to vector<2x256xf32>
    %639 = vector.broadcast %636 : f32 to vector<2x256xf32>
    %640 = arith.mulf %639, %638 : vector<2x256xf32>
    %641 = arith.addf %635, %640 : vector<2x256xf32>
    %c96_291 = arith.constant 96 : index
    %642 = memref.load %arg2[%c96_291] : memref<98xf32, #tpu.memory_space<smem>>
    %c1_292 = arith.constant 1 : index
    %c0_293 = arith.constant 0 : index
    %c101_294 = arith.constant 101 : index
    %643 = vector.load %arg5[%c1_292, %c0_293, %c101_294] : memref<2x2x358xf32, #tpu.memory_space<vmem>>, vector<1x2x256xf32>
    %644 = vector.shape_cast %643 : vector<1x2x256xf32> to vector<2x256xf32>
    %645 = vector.broadcast %642 : f32 to vector<2x256xf32>
    %646 = arith.mulf %645, %644 : vector<2x256xf32>
    %647 = arith.addf %641, %646 : vector<2x256xf32>
    %648 = vector.broadcast %558 : vector<1x256xf32> to vector<2x256xf32>
    %649 = arith.mulf %647, %648 : vector<2x256xf32>
    %650 = arith.addf %604, %649 : vector<2x256xf32>
    %c3_i32 = arith.constant 3 : i32
    %651 = vector.broadcast %c3_i32 : i32 to vector<1x256xi32>
    %652 = arith.addi %30, %651 : vector<1x256xi32>
    %c0_i32_295 = arith.constant 0 : i32
    %653 = vector.broadcast %c0_i32_295 : i32 to vector<1x256xi32>
    %654 = arith.cmpi sge, %652, %653 : vector<1x256xi32>
    %c3_i32_296 = arith.constant 3 : i32
    %655 = vector.broadcast %c3_i32_296 : i32 to vector<1x256xi32>
    %656 = arith.addi %30, %655 : vector<1x256xi32>
    %c16_i32_297 = arith.constant 16 : i32
    %657 = vector.broadcast %c16_i32_297 : i32 to vector<1x256xi32>
    %658 = arith.cmpi slt, %656, %657 : vector<1x256xi32>
    %659 = arith.andi %654, %658 : vector<1x256xi1>
    %660 = arith.extui %659 : vector<1x256xi1> to vector<1x256xi32>
    %661 = arith.sitofp %660 : vector<1x256xi32> to vector<1x256xf32>
    %cst_298 = arith.constant 0.000000e+00 : f32
    %662 = vector.broadcast %cst_298 : f32 to vector<2x256xf32>
    %c6 = arith.constant 6 : index
    %663 = memref.load %arg2[%c6] : memref<98xf32, #tpu.memory_space<smem>>
    %c0_299 = arith.constant 0 : index
    %c0_300 = arith.constant 0 : index
    %c6_301 = arith.constant 6 : index
    %664 = vector.load %arg5[%c0_299, %c0_300, %c6_301] : memref<2x2x358xf32, #tpu.memory_space<vmem>>, vector<1x2x256xf32>
    %665 = vector.shape_cast %664 : vector<1x2x256xf32> to vector<2x256xf32>
    %666 = vector.broadcast %663 : f32 to vector<2x256xf32>
    %667 = arith.mulf %666, %665 : vector<2x256xf32>
    %668 = arith.addf %662, %667 : vector<2x256xf32>
    %c13 = arith.constant 13 : index
    %669 = memref.load %arg2[%c13] : memref<98xf32, #tpu.memory_space<smem>>
    %c0_302 = arith.constant 0 : index
    %c0_303 = arith.constant 0 : index
    %c22_304 = arith.constant 22 : index
    %670 = vector.load %arg5[%c0_302, %c0_303, %c22_304] : memref<2x2x358xf32, #tpu.memory_space<vmem>>, vector<1x2x256xf32>
    %671 = vector.shape_cast %670 : vector<1x2x256xf32> to vector<2x256xf32>
    %672 = vector.broadcast %669 : f32 to vector<2x256xf32>
    %673 = arith.mulf %672, %671 : vector<2x256xf32>
    %674 = arith.addf %668, %673 : vector<2x256xf32>
    %c20_305 = arith.constant 20 : index
    %675 = memref.load %arg2[%c20_305] : memref<98xf32, #tpu.memory_space<smem>>
    %c0_306 = arith.constant 0 : index
    %c0_307 = arith.constant 0 : index
    %c38_308 = arith.constant 38 : index
    %676 = vector.load %arg5[%c0_306, %c0_307, %c38_308] : memref<2x2x358xf32, #tpu.memory_space<vmem>>, vector<1x2x256xf32>
    %677 = vector.shape_cast %676 : vector<1x2x256xf32> to vector<2x256xf32>
    %678 = vector.broadcast %675 : f32 to vector<2x256xf32>
    %679 = arith.mulf %678, %677 : vector<2x256xf32>
    %680 = arith.addf %674, %679 : vector<2x256xf32>
    %c27 = arith.constant 27 : index
    %681 = memref.load %arg2[%c27] : memref<98xf32, #tpu.memory_space<smem>>
    %c0_309 = arith.constant 0 : index
    %c0_310 = arith.constant 0 : index
    %c54_311 = arith.constant 54 : index
    %682 = vector.load %arg5[%c0_309, %c0_310, %c54_311] : memref<2x2x358xf32, #tpu.memory_space<vmem>>, vector<1x2x256xf32>
    %683 = vector.shape_cast %682 : vector<1x2x256xf32> to vector<2x256xf32>
    %684 = vector.broadcast %681 : f32 to vector<2x256xf32>
    %685 = arith.mulf %684, %683 : vector<2x256xf32>
    %686 = arith.addf %680, %685 : vector<2x256xf32>
    %c34_312 = arith.constant 34 : index
    %687 = memref.load %arg2[%c34_312] : memref<98xf32, #tpu.memory_space<smem>>
    %c0_313 = arith.constant 0 : index
    %c0_314 = arith.constant 0 : index
    %c70_315 = arith.constant 70 : index
    %688 = vector.load %arg5[%c0_313, %c0_314, %c70_315] : memref<2x2x358xf32, #tpu.memory_space<vmem>>, vector<1x2x256xf32>
    %689 = vector.shape_cast %688 : vector<1x2x256xf32> to vector<2x256xf32>
    %690 = vector.broadcast %687 : f32 to vector<2x256xf32>
    %691 = arith.mulf %690, %689 : vector<2x256xf32>
    %692 = arith.addf %686, %691 : vector<2x256xf32>
    %c41 = arith.constant 41 : index
    %693 = memref.load %arg2[%c41] : memref<98xf32, #tpu.memory_space<smem>>
    %c0_316 = arith.constant 0 : index
    %c0_317 = arith.constant 0 : index
    %c86_318 = arith.constant 86 : index
    %694 = vector.load %arg5[%c0_316, %c0_317, %c86_318] : memref<2x2x358xf32, #tpu.memory_space<vmem>>, vector<1x2x256xf32>
    %695 = vector.shape_cast %694 : vector<1x2x256xf32> to vector<2x256xf32>
    %696 = vector.broadcast %693 : f32 to vector<2x256xf32>
    %697 = arith.mulf %696, %695 : vector<2x256xf32>
    %698 = arith.addf %692, %697 : vector<2x256xf32>
    %c48_319 = arith.constant 48 : index
    %699 = memref.load %arg2[%c48_319] : memref<98xf32, #tpu.memory_space<smem>>
    %c0_320 = arith.constant 0 : index
    %c0_321 = arith.constant 0 : index
    %c102 = arith.constant 102 : index
    %700 = vector.load %arg5[%c0_320, %c0_321, %c102] : memref<2x2x358xf32, #tpu.memory_space<vmem>>, vector<1x2x256xf32>
    %701 = vector.shape_cast %700 : vector<1x2x256xf32> to vector<2x256xf32>
    %702 = vector.broadcast %699 : f32 to vector<2x256xf32>
    %703 = arith.mulf %702, %701 : vector<2x256xf32>
    %704 = arith.addf %698, %703 : vector<2x256xf32>
    %705 = vector.broadcast %661 : vector<1x256xf32> to vector<2x256xf32>
    %706 = arith.mulf %704, %705 : vector<2x256xf32>
    %707 = arith.addf %650, %706 : vector<2x256xf32>
    %cst_322 = arith.constant 0.000000e+00 : f32
    %708 = vector.broadcast %cst_322 : f32 to vector<2x256xf32>
    %c55 = arith.constant 55 : index
    %709 = memref.load %arg2[%c55] : memref<98xf32, #tpu.memory_space<smem>>
    %c1_323 = arith.constant 1 : index
    %c0_324 = arith.constant 0 : index
    %c6_325 = arith.constant 6 : index
    %710 = vector.load %arg5[%c1_323, %c0_324, %c6_325] : memref<2x2x358xf32, #tpu.memory_space<vmem>>, vector<1x2x256xf32>
    %711 = vector.shape_cast %710 : vector<1x2x256xf32> to vector<2x256xf32>
    %712 = vector.broadcast %709 : f32 to vector<2x256xf32>
    %713 = arith.mulf %712, %711 : vector<2x256xf32>
    %714 = arith.addf %708, %713 : vector<2x256xf32>
    %c62 = arith.constant 62 : index
    %715 = memref.load %arg2[%c62] : memref<98xf32, #tpu.memory_space<smem>>
    %c1_326 = arith.constant 1 : index
    %c0_327 = arith.constant 0 : index
    %c22_328 = arith.constant 22 : index
    %716 = vector.load %arg5[%c1_326, %c0_327, %c22_328] : memref<2x2x358xf32, #tpu.memory_space<vmem>>, vector<1x2x256xf32>
    %717 = vector.shape_cast %716 : vector<1x2x256xf32> to vector<2x256xf32>
    %718 = vector.broadcast %715 : f32 to vector<2x256xf32>
    %719 = arith.mulf %718, %717 : vector<2x256xf32>
    %720 = arith.addf %714, %719 : vector<2x256xf32>
    %c69_329 = arith.constant 69 : index
    %721 = memref.load %arg2[%c69_329] : memref<98xf32, #tpu.memory_space<smem>>
    %c1_330 = arith.constant 1 : index
    %c0_331 = arith.constant 0 : index
    %c38_332 = arith.constant 38 : index
    %722 = vector.load %arg5[%c1_330, %c0_331, %c38_332] : memref<2x2x358xf32, #tpu.memory_space<vmem>>, vector<1x2x256xf32>
    %723 = vector.shape_cast %722 : vector<1x2x256xf32> to vector<2x256xf32>
    %724 = vector.broadcast %721 : f32 to vector<2x256xf32>
    %725 = arith.mulf %724, %723 : vector<2x256xf32>
    %726 = arith.addf %720, %725 : vector<2x256xf32>
    %c76 = arith.constant 76 : index
    %727 = memref.load %arg2[%c76] : memref<98xf32, #tpu.memory_space<smem>>
    %c1_333 = arith.constant 1 : index
    %c0_334 = arith.constant 0 : index
    %c54_335 = arith.constant 54 : index
    %728 = vector.load %arg5[%c1_333, %c0_334, %c54_335] : memref<2x2x358xf32, #tpu.memory_space<vmem>>, vector<1x2x256xf32>
    %729 = vector.shape_cast %728 : vector<1x2x256xf32> to vector<2x256xf32>
    %730 = vector.broadcast %727 : f32 to vector<2x256xf32>
    %731 = arith.mulf %730, %729 : vector<2x256xf32>
    %732 = arith.addf %726, %731 : vector<2x256xf32>
    %c83_336 = arith.constant 83 : index
    %733 = memref.load %arg2[%c83_336] : memref<98xf32, #tpu.memory_space<smem>>
    %c1_337 = arith.constant 1 : index
    %c0_338 = arith.constant 0 : index
    %c70_339 = arith.constant 70 : index
    %734 = vector.load %arg5[%c1_337, %c0_338, %c70_339] : memref<2x2x358xf32, #tpu.memory_space<vmem>>, vector<1x2x256xf32>
    %735 = vector.shape_cast %734 : vector<1x2x256xf32> to vector<2x256xf32>
    %736 = vector.broadcast %733 : f32 to vector<2x256xf32>
    %737 = arith.mulf %736, %735 : vector<2x256xf32>
    %738 = arith.addf %732, %737 : vector<2x256xf32>
    %c90 = arith.constant 90 : index
    %739 = memref.load %arg2[%c90] : memref<98xf32, #tpu.memory_space<smem>>
    %c1_340 = arith.constant 1 : index
    %c0_341 = arith.constant 0 : index
    %c86_342 = arith.constant 86 : index
    %740 = vector.load %arg5[%c1_340, %c0_341, %c86_342] : memref<2x2x358xf32, #tpu.memory_space<vmem>>, vector<1x2x256xf32>
    %741 = vector.shape_cast %740 : vector<1x2x256xf32> to vector<2x256xf32>
    %742 = vector.broadcast %739 : f32 to vector<2x256xf32>
    %743 = arith.mulf %742, %741 : vector<2x256xf32>
    %744 = arith.addf %738, %743 : vector<2x256xf32>
    %c97_343 = arith.constant 97 : index
    %745 = memref.load %arg2[%c97_343] : memref<98xf32, #tpu.memory_space<smem>>
    %c1_344 = arith.constant 1 : index
    %c0_345 = arith.constant 0 : index
    %c102_346 = arith.constant 102 : index
    %746 = vector.load %arg5[%c1_344, %c0_345, %c102_346] : memref<2x2x358xf32, #tpu.memory_space<vmem>>, vector<1x2x256xf32>
    %747 = vector.shape_cast %746 : vector<1x2x256xf32> to vector<2x256xf32>
    %748 = vector.broadcast %745 : f32 to vector<2x256xf32>
    %749 = arith.mulf %748, %747 : vector<2x256xf32>
    %750 = arith.addf %744, %749 : vector<2x256xf32>
    %751 = vector.broadcast %661 : vector<1x256xf32> to vector<2x256xf32>
    %752 = arith.mulf %750, %751 : vector<2x256xf32>
    %753 = arith.addf %707, %752 : vector<2x256xf32>
    %754 = arith.negf %753 : vector<2x256xf32>
    %755 = math.exp %754 : vector<2x256xf32>
    %cst_347 = arith.constant 1.000000e+00 : f32
    %756 = vector.broadcast %cst_347 : f32 to vector<2x256xf32>
    %757 = arith.addf %756, %755 : vector<2x256xf32>
    %758 = arith.divf %756, %757 : vector<2x256xf32>
    %759 = vector.shape_cast %758 : vector<2x256xf32> to vector<2x1x256xf32>
    %760 = vector.broadcast %759 : vector<2x1x256xf32> to vector<2x4x256xf32>
    %761 = arith.mulf %0, %760 : vector<2x4x256xf32>
    %c0_348 = arith.constant 0 : index
    %c0_349 = arith.constant 0 : index
    %c0_350 = arith.constant 0 : index
    %762 = vector.load %arg4[%c0_348, %c0_349, %c0_350] : memref<2x4x256xf32, #tpu.memory_space<vmem>>, vector<2x4x256xf32>
    tpu.vector_store %arg4[%c0_348, %c0_349, %c0_350], %761 {strides = array<i32>} : memref<2x4x256xf32, #tpu.memory_space<vmem>>, vector<2x4x256xf32>,
    return
  }
  func.func @transform_0(%arg0: i32) -> (i32, i32, i32) {
    %c0_i32 = arith.constant 0 : i32
    %c0_i32_0 = arith.constant 0 : i32
    %c0_i32_1 = arith.constant 0 : i32
    return %arg0, %c0_i32, %c0_i32_0 : i32, i32, i32
  }
  func.func @transform_1(%arg0: i32) -> i32 {
    %c0_i32 = arith.constant 0 : i32
    %c0_i32_0 = arith.constant 0 : i32
    return %c0_i32 : i32
  }
  func.func @transform_2(%arg0: i32) -> i32 {
    %c0_i32 = arith.constant 0 : i32
    %c0_i32_0 = arith.constant 0 : i32
    return %c0_i32 : i32
  }
  func.func @transform_3(%arg0: i32) -> (i32, i32, i32) {
    %c0_i32 = arith.constant 0 : i32
    %c0_i32_0 = arith.constant 0 : i32
    %c0_i32_1 = arith.constant 0 : i32
    return %arg0, %c0_i32, %c0_i32_0 : i32, i32, i32
  }
}

</mosaic_0001>

<bundles_post_ra>
// kernel: tpu_custom_call.1
= control target key start
LH: loop header
LB: loop body
LE: loop exit
PB: predicated region body
PF: predicated region fallthrough
CT: control target
= control target key end

     0   :  { %9 = vsyncpa [#allocation5], 0  ;;  %s2403_s0 = inlined_call_operand.hbm [shape: f32[2,4,256], index: 0, kind: input, shape index: {}]   ;;  %s2404_s1 = inlined_call_operand.vmem [shape: f32[98], index: 1, kind: input, shape index: {}]   ;;  %s2405_s2 = inlined_call_operand.<no memory space> [shape: f32[1], index: 2, kind: input, shape index: {}]   ;;  %s2406_s3 = inlined_call_operand.hbm [shape: f32[2,4,256], index: 3, kind: output, shape index: {}]  }
   0x1   :  { %10 = vsyncpa [#allocation7], 0 }
   0x2   :  { %11 = vsyncpa [#allocation6], 0  ;;  %s1701_s12 = smov [#allocation4]   ;;  %s30_s16 = sshll.u32 %s2404_s1, 4  ;;  %s31_s16 = int_to_ptr.vmem [resolvable:$true] %s30_s16 }
   0x3   :  { %s17_s13 = sshll.u32 %s1701_s12, 4  ;;  %s18_s13 = int_to_ptr.vmem [resolvable:$true] %s17_s13 }
   0x4   :  { %s1651_s17 = scalar_lea.vmem %s18_s13, 256  ;;  %p1656_p1 = scmp.lt.s32.totalorder %s18_s13, %s18_s13 }
   0x5   :  { %p1652_p0 = scmp.ne.s32.totalorder %s18_s13, %s1651_s17  ;;  %p1657_p2 = scmp.lt.s32.totalorder %s1651_s17, %s1651_s17 }
   0x7   :  { %p1658_p3 = por %p1657_p2, %p1656_p1 }
   0x9   :  { %p1659_p4 = pnand %p1658_p3, %p1652_p0 }
   0xb   :  { %1662 = shalt.err (!%p1659_p4)
}
   0xc   :  { %s1702_s18 = smov 128   ;;  %s1703_s19 = smov 8  }
   0xd   :  { %23 = dma.hbm_to_vmem [thread:$0]  %s2403_s0, 256, %s18_s13, [#allocation5], %s1702_s18, %s1702_s18, %s1703_s19  }
   0xe   :  { %s1663_s22 = scalar_lea.vmem %s31_s16, 16  ;;  %p1668_p6 = scmp.lt.s32.totalorder %s31_s16, %s31_s16 }
   0xf   :  { %p1664_p5 = scmp.ne.s32.totalorder %s31_s16, %s1663_s22  ;;  %p1669_p7 = scmp.lt.s32.totalorder %s1663_s22, %s1663_s22 }
  0x11   :  { %p1670_p8 = por %p1669_p7, %p1668_p6 }
  0x13   :  { %p1671_p9 = pnand %p1670_p8, %p1664_p5 }
  0x15   :  { %1674 = shalt.err (!%p1671_p9)
}
  0x16   :  { %s1704_s1 = smov [#allocation8]  }
  0x17   :  { %33 = dma.vmem_to_smem %s31_s16, 16, %s1704_s1, [#allocation7]  }
  0x18   :  { %1695 = dma.done.wait [#allocation5], 256  }
  0x19   :  { %1696 = vsyncadd [#allocation5], 4294967040 }
  0x1a   :  { %1697 = dma.done.wait [#allocation7], 16  }
  0x1b   :  { %1698 = vsyncadd [#allocation7], 4294967280 }
  0x1c   :  { %42 = sfence }
  0x1d   :  { %v127_v0 = vlaneseq  ;;  %v1705_v1 = vmov 1983009808   ;;  %v43_v3 = vld [vmem:[#allocation4] sm:$0xff]  ;;  %v44_v4 = vld [vmem:[#allocation4 + $0x8] sm:$0xff]  ;;  %vm51_vm0 = vcmask 1043456   ;;  %v1706_v10 = vmov 1.0  }
  0x1e   :  { %v125_v2 = vunpack.c.l.s4 %v1705_v1  ;;  %v47_v7 = vcombine.high %v43_v3, %v43_v3  ;;  %v48_v8 = vcombine.high %v44_v4, %v44_v4  ;;  %v819_v11 = vcombine.low %v1706_v10, %v1706_v10  ;;  %s1707_s0 = smov 3   ;;  %s1709_s23 = smov 1  }
  0x1f   :  { %v1758_v5 = vshrl.u32 %v127_v0, 7  ;;  %v199_v6 = vand.u32 127, %v127_v0  ;;  %v52_v12 = vsel %vm51_vm0, %v43_v3, -inf  ;;  %v66_v13 = vsel %vm51_vm0, %v44_v4, -inf  ;;  %s1710_s24 = smov 51   ;;  %s1711_s25 = smov 2  }
  0x20   :  { %v126_v9 = vunpack.c.0.s8 %v125_v2  ;;  %v53_v16 = vrot.slane %v52_v12, 4  ;;  %v59_v17 = vsel %vm51_vm0, %v47_v7, -inf  ;;  %v67_v20 = vrot.slane %v66_v13, 4  ;;  %s1712_s26 = smov 4   ;;  %s1713_s27 = smov 5  }
  0x21   :  { %v200_v14 = vadd.s32 128, %v199_v6  ;;  %v1762_v15 = vand.u32 15, %v199_v6  ;;  %v60_v19 = vrot.slane %v59_v17, 4  ;;  %v73_v21 = vsel %vm51_vm0, %v48_v8, -inf  ;;  %s1516_s28 = sld [smem:[#allocation8 + $0xf]]  ;;  %s1714_s9 = smov 96  }
  0x22   :  { %v1766_v18 = vsub.s32 %v126_v9, %v1758_v5  ;;  %v54_v24 = vmax.f32 %v52_v12, %v53_v16  ;;  %v74_v25 = vrot.slane %v73_v21, 4  ;;  %v68_v28 = vmax.f32 %v66_v13, %v67_v20  ;;  %s1499_s29 = sld [smem:[#allocation8 + $0x7]]  ;;  %s1715_s10 = smov 112  }
  0x23   :  { %v1769_v22 = vand.u32 15, %v200_v14  ;;  %v392_v23 = vadd.s32 4294967294, %v1762_v15  ;;  %v61_v27 = vmax.f32 %v59_v17, %v60_v19  ;;  %v1708_v32 = vmov 0.0   ;;  %s1517_s30 = sld [smem:[#allocation8 + $0x16]]  ;;  %s1716_s13 = smov 80  }
  0x24   :  { %v826_v26 = vrot.slane %v819_v11, %v1766_v18  ;;  %v55_v30 = vrot.slane %v54_v24, 2  ;;  %v75_v31 = vmax.f32 %v73_v21, %v74_v25  ;;  %v69_v35 = vrot.slane %v68_v28, 2  ;;  %s1515_s4 = sld [smem:[#allocation8 + $0x8]]  ;;  %s1717_s16 = smov 64  }
  0x25   :  { %v393_v29 = vadd.s32 4294967294, %v1769_v22  ;;  %vm394_vm1 = vcmp.ge.s32.totalorder %v392_v23, 0  ;;  %v62_v34 = vrot.slane %v61_v27, 2  ;;  %v80_v38 = vsel %vm51_vm0, %v43_v3, 0.0  ;;  %s1531_s5 = sld [smem:[#allocation8 + $0x9]]  ;;  %s1718_s21 = smov 32  }
  0x26   :  { %827 = vrot.lane.b32.xlu0 %v826_v26, %s1707_s0  ;;  %v1512_v33 = vsel %vm394_vm1, 1.0, %v1708_v32  ;;  %v56_v36 = vmax.f32 %v54_v24, %v55_v30  ;;  %v76_v37 = vrot.slane %v75_v31, 2  ;;  %v70_v41 = vmax.f32 %v68_v28, %v69_v35  ;;  %s1518_s6 = sld [smem:[#allocation8 + $0x1d]]  ;;  %s1719_s0 = smov 48  }
  0x27   :  { %vm395_vm2 = vcmp.ge.s32.totalorder %v393_v29, 0  ;;  %v63_v40 = vmax.f32 %v61_v27, %v62_v34  ;;  %v81_v42 = vrot.slane %v80_v38, 4  ;;  %v87_v46 = vsel %vm51_vm0, %v47_v7, 0.0  ;;  %s1831_s7 = sld [smem:[#allocation8 + $0x2b]] }
  0x28   :  { %v1513_v39 = vsel %vm395_vm2, 1.0, %v1708_v32  ;;  %v57_v44 = vrot.slane %v56_v36, 1  ;;  %v77_v45 = vmax.f32 %v75_v31, %v76_v37  ;;  %v71_v48 = vrot.slane %v70_v41, 1  ;;  %s1532_s8 = sld [smem:[#allocation8 + $0x10]] }
  0x29   :  { %v471_v43 = vcombine.low %v1512_v33, %v1513_v39  ;;  %v64_v47 = vrot.slane %v63_v40, 1  ;;  %vm144_vm3 = vcmask 1041409   ;;  %v82_v49 = vadd.f32 %v81_v42, %v80_v38  ;;  %s1534_s11 = sld [smem:[#allocation8 + $0x1e]] }
  0x2a   :  { %v88_v50 = vrot.slane %v87_v46, 4  ;;  %v58_v52 = vmax.f32 %v56_v36, %v57_v44  ;;  %v78_v53 = vrot.slane %v77_v45, 1  ;;  %v94_v54 = vsel %vm51_vm0, %v44_v4, 0.0  ;;  %s1519_s12 = sld [smem:[#allocation8 + $0x24]] }
  0x2b   :  { %v478_v51 = vrot.slane %v471_v43, %v1766_v18  ;;  %v65_v55 = vmax.f32 %v63_v40, %v64_v47  ;;  %v72_v56 = vmax.f32 %v70_v41, %v71_v48  ;;  %v83_v57 = vrot.slane %v82_v49, 2  ;;  %s1546_s14 = sld [smem:[#allocation8 + $0x11]] }
  0x2c   :  { %v89_v58 = vadd.f32 %v88_v50, %v87_v46  ;;  %v79_v59 = vmax.f32 %v77_v45, %v78_v53  ;;  %vm146_vm4 = vcmask 1043459   ;;  %v95_v60 = vrot.slane %v94_v54, 4  ;;  %s1533_s15 = sld [smem:[#allocation8 + $0x17]] }
  0x2d   :  { %479 = vrot.lane.b32.xlu0 %v478_v51, %s1709_s23  ;;  %v101_v61 = vsel %vm51_vm0, %v48_v8, 0.0  ;;  %v123_v62 = vcombine.low %v58_v52, %v65_v55  ;;  %v84_v63 = vadd.f32 %v83_v57, %v82_v49  ;;  %vm148_vm5 = vcmask 1045509   ;;  %s1535_s17 = sld [smem:[#allocation8 + $0x25]] }
  0x2e   :  { %v90_v0 = vrot.slane %v89_v58, 2  ;;  %v102_v1 = vrot.slane %v101_v61, 4  ;;  %v131_v2 = vcombine.low %v72_v56, %v79_v59  ;;  %v96_v3 = vadd.f32 %v95_v60, %v94_v54  ;;  %s1545_s20 = sld [smem:[#allocation8 + $0xa]] }
  0x2f   :  { %v567_v4 = vadd.s32 4294967295, %v1762_v15  ;;  %v130_v6 = vrot.slane %v123_v62, %v1766_v18  ;;  %v85_v7 = vrot.slane %v84_v63, 1  ;;  %v568_v13 = vadd.s32 4294967295, %v1769_v22  ;;  %s1547_s22 = sld [smem:[#allocation8 + $0x18]] }
  0x30   :  { %v91_v9 = vadd.f32 %v90_v0, %v89_v58  ;;  %v103_v10 = vadd.f32 %v102_v1, %v101_v61  ;;  %v138_v11 = vrot.slane %v131_v2, %v1766_v18  ;;  %v97_v12 = vrot.slane %v96_v3, 2  ;;  %s1536_s1 = sld [smem:[#allocation8 + $0x2c]] }
  0x31   :  { %vm569_vm6 = vcmp.ge.s32.totalorder %v567_v4, 0  ;;  %v86_v8 = vadd.f32 %v85_v7, %v84_v63  ;;  %vm570_vm7 = vcmp.ge.s32.totalorder %v568_v13, 0  ;;  %vm113_vm8 = vcmask 410624   ;;  %s1561_s23 = sld [smem:[#allocation8 + $0xb]] }
  0x32   :  { %v92_v14 = vrot.slane %v91_v9, 1  ;;  %v104_v16 = vrot.slane %v103_v10, 2  ;;  %v1528_v17 = vsel %vm569_vm6, 1.0, %v1708_v32  ;;  %v143_v19 = vrot.slane %v138_v11, 7  ;;  %114 = vst.msk [vmem:[#allocation2] sm:$0x3] %vm113_vm8, %v1708_v32 }
  0x33   :  { %v98_v20 = vadd.f32 %v97_v12, %v96_v3  ;;  %vm150_vm9 = vcmask 1047559   ;;  %v1529_v24 = vsel %vm570_vm7, 1.0, %v1708_v32  ;;  %115 = vst.msk [vmem:[#allocation2 + $0x6] sm:$0x3] %vm113_vm8, %v1708_v32  ;;  %vm116_vm10 = vcmask 828824  }
  0x34   :  { %v93_v21 = vadd.f32 %v92_v14, %v91_v9  ;;  %v105_v23 = vadd.f32 %v104_v16, %v103_v10  ;;  %v145_v25 = vsel %vm144_vm3, %v143_v19, %v130_v6  ;;  %v646_v27 = vcombine.low %v1528_v17, %v1529_v24  ;;  %117 = vst.msk [vmem:[#allocation2 + $0x4] sm:$0x3] %vm116_vm10, %v1708_v32 }
  0x35   :  { %v99_v26 = vrot.slane %v98_v20, 1  ;;  %v147_v28 = vsel %vm146_vm4, %v143_v19, %v145_v25  ;;  %v109_v30 = vmul.f32 0.25, %v86_v8  ;;  %118 = vst.msk [vmem:[#allocation2 + $0xa] sm:$0x3] %vm116_vm10, %v1708_v32  ;;  %v915_v39 = vadd.s32 1, %v1762_v15 }
  0x36   :  { %v106_v29 = vrot.slane %v105_v23, 1  ;;  %v110_v31 = vmul.f32 0.25, %v93_v21  ;;  %v149_v33 = vsel %vm148_vm5, %v143_v19, %v147_v28  ;;  %v653_v35 = vrot.slane %v646_v27, %v1766_v18 }
  0x37   :  { %v100_v34 = vadd.f32 %v99_v26, %v98_v20  ;;  %v151_v36 = vsel %vm150_vm9, %v143_v19, %v149_v33  ;;  %v916_v40 = vadd.s32 1, %v1769_v22  ;;  %v1090_v43 = vadd.s32 2, %v1762_v15 }
  0x38   :  { %v107_v37 = vadd.f32 %v106_v29, %v105_v23  ;;  %152 = vrot.lane.b32.xlu0 %v151_v36, %s1710_s24  ;;  %654 = vrot.lane.b32.xlu1 %v653_v35, %s1711_s25  ;;  %v168_v42 = vcombine.low %v109_v30, %v110_v31  ;;  %v1091_v44 = vadd.s32 2, %v1769_v22  ;;  %vm919_vm11 = vcmp.lt.s32.totalorder %v915_v39, 16  ;;  %s1550_s25 = sld [smem:[#allocation8 + $0x2d]] }
  0x39   :  { %v111_v38 = vmul.f32 0.25, %v100_v34  ;;  %vm920_vm12 = vcmp.lt.s32.totalorder %v916_v40, 16  ;;  %v1558_v46 = vsel %vm919_vm11, 1.0, %v1708_v32  ;;  %vm1094_vm13 = vcmp.lt.s32.totalorder %v1090_v43, 16 }
  0x3a   :  { %v112_v41 = vmul.f32 0.25, %v107_v37  ;;  %v1559_v47 = vsel %vm920_vm12, 1.0, %v1708_v32  ;;  %vm1095_vm14 = vcmp.lt.s32.totalorder %v1091_v44, 16  ;;  %v1574_v49 = vsel %vm1094_vm13, 1.0, %v1708_v32 }
  0x3b   :  { %v994_v48 = vcombine.low %v1558_v46, %v1559_v47  ;;  %v175_v50 = vrot.slane %v168_v42, %v1766_v18  ;;  %v1575_v52 = vsel %vm1095_vm14, 1.0, %v1708_v32  ;;  %vm158_vm15 = vcmask 1041816  }
  0x3c   :  { %v176_v45 = vcombine.low %v111_v38, %v112_v41  ;;  %v1169_v54 = vcombine.low %v1574_v49, %v1575_v52  ;;  %vm159_vm0 = vcmask 1043458   ;;  %vm161_vm2 = vcmask 414724  }
  0x3d   :  { %v1001_v53 = vrot.slane %v994_v48, %v1766_v18  ;;  %vm160_vm1 = vmor %vm159_vm0, %vm158_vm15  ;;  %vm155_vm6 = vcmask 416768   ;;  %v420_v3 = vstv %s1516_s28  ;;  %v246_v4 = vstv %s1499_s29  ;;  %s1549_s28 = sld [smem:[#allocation8 + $0x26]] }
  0x3e   :  { %v183_v51 = vrot.slane %v176_v45, %v1766_v18  ;;  %v1176_v56 = vrot.slane %v1169_v54, %v1766_v18  ;;  %v430_v11 = vstv %s1517_s30  ;;  %v410_v12 = vstv %s1515_s4  ;;  %s1578_s29 = sld [smem:[#allocation8 + $0x13]] }
  0x3f   :  { %1002 = vrot.lane.b32.xlu1 %v1001_v53, %s1712_s26  ;;  %v585_v19 = vstv %s1531_s5  ;;  %v440_v20 = vstv %s1518_s6  ;;  %v460_v25 = vstv %s1831_s7  ;;  %s1562_s26 = sld [smem:[#allocation8 + $0x12]]  ;;  %vm252_vm7 = vcmask 916480  }
  0x40   :  { %v186_v55 = vrot.slane %v183_v51, 7  ;;  %v595_v26 = vstv %s1532_s8  ;;  %v615_v29 = vstv %s1534_s11  ;;  %v450_v30 = vstv %s1519_s12  ;;  %s1563_s30 = sld [smem:[#allocation8 + $0x19]] }
  0x41   :  { %v768_v35 = vstv %s1546_s14  ;;  %v605_v36 = vstv %s1533_s15  ;;  %v625_v39 = vstv %s1535_s17  ;;  %v758_v40 = vstv %s1545_s20  ;;  %s1565_s4 = sld [smem:[#allocation8 + $0x27]] }
  0x42   :  { %v187_v57 = vsel %vm144_vm3, %v186_v55, %v175_v50  ;;  %vm1818_vm3 = vmor %vm161_vm2, %vm160_vm1  ;;  %v778_v43 = vstv %s1547_s22  ;;  %v635_v44 = vstv %s1536_s1  ;;  %v933_v48 = vstv %s1561_s23  ;;  %s1577_s5 = sld [smem:[#allocation8 + $0xc]] }
  0x43   :  { %v188_v58 = vsel %vm146_vm4, %v186_v55, %v187_v57  ;;  %1177 = vrot.lane.b32.xlu1 %v1176_v56, %s1713_s27  ;;  %s1564_s27 = sld [smem:[#allocation8 + $0x20]]  ;;  %v808_v52 = vstv %s1550_s25  ;;  %v798_v57 = vstv %s1549_s28  ;;  %vm263_vm8 = vcmask 785408  }
  0x44   :  { %v189_v59 = vsel %vm148_vm5, %v186_v55, %v188_v58  ;;  %s1579_s6 = sld [smem:[#allocation8 + $0x1a]]  ;;  %vm285_vm10 = vcmask 523264   ;;  %vm307_vm11 = vcmask 261120   ;;  %vm296_vm12 = vcmask 392192  }
  0x45   :  { %v190_v60 = vsel %vm150_vm9, %v186_v55, %v189_v59  ;;  %v943_v53 = vstv %s1562_s26  ;;  %s1566_s7 = sld [smem:[#allocation8 + $0x2e]]  ;;  %vm274_vm9 = vcmask 654336   ;;  %vm482_vm13 = vcmask 7168  }
  0x46   :  { %191 = vrot.lane.b32.xlu0 %v190_v60, %s1710_s24  ;;  %s1548_s24 = sld [smem:[#allocation8 + $0x1f]]  ;;  %v953_v0 = vstv %s1563_s30  ;;  %vm657_vm14 = vcmask 15360   ;;  %vm830_vm15 = vcmask 23552   ;;  %vm1005_vm0 = vcmask 31744  }
  0x47   :  { %s1593_s8 = sld [smem:[#allocation8 + $0xd]]  ;;  %vm1180_vm1 = vcmask 39936   ;;  %vm1355_vm2 = vcmask 48128  }
  0x48   :  { %s1580_s11 = sld [smem:[#allocation8 + $0x21]] }
  0x49   :  { %v963_v56 = vstv %s1564_s27  ;;  %s1594_s12 = sld [smem:[#allocation8 + $0x14]] }
  0x4a   :  { %s1524_s14 = sld [smem:[#allocation8 + $0x47]] }
  0x4b   :  { %s1581_s15 = sld [smem:[#allocation8 + $0x28]] }
  0x4c   :  { %v788_v49 = vstv %s1548_s24  ;;  %s1538_s17 = sld [smem:[#allocation8 + $0x3a]] }
  0x4d   :  { %s1595_s20 = sld [smem:[#allocation8 + $0x1b]] }
  0x4e   :  { %s1525_s22 = sld [smem:[#allocation8 + $0x4e]] }
  0x4f   :  { %s1582_s1 = sld [smem:[#allocation8 + $0x2f]] }
  0x50   :  { %s1539_s23 = sld [smem:[#allocation8 + $0x41]] }
  0x51   :  { %s1596_s24 = sld [smem:[#allocation8 + $0x22]] }
  0x52   :  { %s1542_s25 = sld [smem:[#allocation8 + $0x56]] }
  0x53   :  { %s1554_s26 = sld [smem:[#allocation8 + $0x49]] }
  0x54   :  { %s1522_s27 = sld [smem:[#allocation8 + $0x39]] }
  0x55   :  { %s1568_s28 = sld [smem:[#allocation8 + $0x3c]] }
  0x56   :  { %s1543_s30 = sld [smem:[#allocation8 + $0x5d]] }
  0x98   :  { %v1814_v61 = vpop.permute.xlu0 %827 }
  0x9f   :  { %v1816_v62 = vpop.permute.xlu0 %479 }
  0xaa   :  { %v153_v63 = vpop.permute.xlu0 %152 }
  0xab   :  { %v154_v1 = vrot.slane %v153_v63, 6 }
  0xad   :  { %v156_v2 = vsel %vm155_vm6, %v154_v1, %v153_v63  ;;  %v1118_v63 = vstv %s1578_s29  ;;  %s1523_s29 = sld [smem:[#allocation8 + $0x40]] }
  0xae   :  { %163 = vst.msk [vmem:[#allocation2] sm:$0x3f] %vm1818_vm3, %v156_v2 }
  0xb5   :  { %v1825_v6 = vld [vmem:[#allocation2] sm:$0x3f] }
  0xb6   :  { %v1827_v7 = vld [vmem:[#allocation2] sm:$0x3f]  ;;  %v421_v9 = vmul.f32 %v420_v3, %v1825_v6  ;;  %v431_v14 = vmul.f32 %v430_v11, %v1825_v6  ;;  %v411_v16 = vmul.f32 %v410_v12, %v1825_v6  ;;  %v441_v24 = vmul.f32 %v440_v20, %v1825_v6 }
  0xb7   :  { %v247_v10 = vmul.f32 %v246_v4, %v1827_v7  ;;  %v1837_v17 = vld [vmem:[#allocation2] sm:$0x3f]  ;;  %v461_v27 = vmul.f32 %v460_v25, %v1825_v6  ;;  %v451_v33 = vmul.f32 %v450_v30, %v1825_v6  ;;  %v973_v3 = vstv %s1565_s4  ;;  %s1526_s4 = sld [smem:[#allocation8 + $0x55]] }
  0xb8   :  { %v192_v13 = vpop.permute.xlu0 %191  ;;  %423 = vrot.lane.b32.xlu0 %v421_v9, %s1714_s9  ;;  %v586_v23 = vmul.f32 %v585_v19, %v1837_v17  ;;  %v596_v28 = vmul.f32 %v595_v26, %v1837_v17  ;;  %v616_v31 = vmul.f32 %v615_v29, %v1837_v17  ;;  %v1855_v34 = vld [vmem:[#allocation2] sm:$0x3f]  ;;  %v606_v38 = vmul.f32 %v605_v36, %v1837_v17 }
  0xb9   :  { %249 = vrot.lane.b32.xlu1 %v247_v10, %s1715_s10  ;;  %v193_v8 = vrot.slane %v192_v13, 6  ;;  %v769_v37 = vmul.f32 %v768_v35, %v1855_v34  ;;  %v626_v41 = vmul.f32 %v625_v39, %v1837_v17  ;;  %v759_v42 = vmul.f32 %v758_v40, %v1855_v34  ;;  %v1869_v47 = vld [vmem:[#allocation2] sm:$0x3f] }
  0xba   :  { %v779_v45 = vmul.f32 %v778_v43, %v1855_v34  ;;  %v636_v46 = vmul.f32 %v635_v44, %v1837_v17  ;;  %v934_v50 = vmul.f32 %v933_v48, %v1869_v47  ;;  %v789_v51 = vmul.f32 %v788_v49, %v1855_v34  ;;  %v1883_v60 = vld [vmem:[#allocation2] sm:$0x3f] }
  0xbb   :  { %v194_v21 = vsel %vm155_vm6, %v193_v8, %v192_v13  ;;  %v809_v54 = vmul.f32 %v808_v52, %v1855_v34  ;;  %v944_v55 = vmul.f32 %v943_v53, %v1869_v47  ;;  %v964_v58 = vmul.f32 %v963_v56, %v1869_v47 }
  0xbc   :  { %433 = vrot.lane.b32.xlu0 %v431_v14, %s1716_s13  ;;  %197 = vst.msk [vmem:[#allocation2 + $0x6] sm:$0x3f] %vm1818_vm3, %v194_v21  ;;  %v799_v59 = vmul.f32 %v798_v57, %v1855_v34  ;;  %v1119_v1 = vmul.f32 %v1118_v63, %v1883_v60  ;;  %v954_v2 = vmul.f32 %v953_v0, %v1869_v47  ;;  %v1108_v4 = vstv %s1577_s5  ;;  %v1897_v14 = vld [vmem:[#allocation2] sm:$0x3f]  ;;  %s1555_s5 = sld [smem:[#allocation8 + $0x50]] }
  0xbd   :  { %413 = vrot.lane.b32.xlu1 %v411_v16, %s1715_s10  ;;  %v974_v9 = vmul.f32 %v973_v3, %v1869_v47  ;;  %v1109_v10 = vmul.f32 %v1108_v4, %v1883_v60  ;;  %v1128_v11 = vstv %s1579_s6  ;;  %v983_v12 = vstv %s1566_s7  ;;  %s1540_s6 = sld [smem:[#allocation8 + $0x48]] }
  0xbe   :  { %v1129_v13 = vmul.f32 %v1128_v11, %v1883_v60  ;;  %v984_v8 = vmul.f32 %v983_v12, %v1869_v47  ;;  %v1283_v16 = vstv %s1593_s8  ;;  %v1138_v19 = vstv %s1580_s11  ;;  %s1569_s7 = sld [smem:[#allocation8 + $0x43]] }
  0xbf   :  { %v1284_v20 = vmul.f32 %v1283_v16, %v1897_v14  ;;  %v1139_v21 = vmul.f32 %v1138_v19, %v1883_v60  ;;  %v520_v25 = vstv %s1524_s14  ;;  %v675_v30 = vstv %s1538_s17  ;;  %s1552_s8 = sld [smem:[#allocation8 + $0x3b]]  ;;  %v1953_v16 = vpop.permute.xlu1 %654 }
  0xc0   :  { %588 = vrot.lane.b32.xlu0 %v586_v23, %s1715_s10  ;;  %v1293_v23 = vstv %s1594_s12  ;;  %v1303_v35 = vstv %s1595_s20  ;;  %v530_v36 = vstv %s1525_s22  ;;  %s1572_s11 = sld [smem:[#allocation8 + $0x58]] }
  0xc1   :  { %443 = vrot.lane.b32.xlu1 %v441_v24, %s1717_s16  ;;  %v1294_v26 = vmul.f32 %v1293_v23, %v1897_v14  ;;  %v1158_v39 = vstv %s1582_s1  ;;  %v685_v40 = vstv %s1539_s23  ;;  %v1313_v43 = vstv %s1596_s24  ;;  %s1527_s12 = sld [smem:[#allocation8 + $0x5c]] }
  0xc2   :  { %v715_v44 = vstv %s1542_s25  ;;  %v868_v49 = vstv %s1554_s26  ;;  %s1586_s14 = sld [smem:[#allocation8 + $0x4b]] }
  0xc3   :  { %v1903_v24 = vld [vmem:[#allocation2 + $0x6] sm:$0x3f]  ;;  %s1600_s17 = sld [smem:[#allocation8 + $0x3e]] }
  0xc4   :  { %463 = vrot.lane.b32.xlu0 %v461_v27, %s1718_s21  ;;  %v521_v27 = vmul.f32 %v520_v25, %v1903_v24  ;;  %v1909_v29 = vld [vmem:[#allocation2 + $0x6] sm:$0x3f]  ;;  %s1553_s20 = sld [smem:[#allocation8 + $0x42]] }
  0xc5   :  { %598 = vrot.lane.b32.xlu1 %v596_v28, %s1714_s9  ;;  %v1148_v28 = vstv %s1581_s15  ;;  %v1927_v48 = vld [vmem:[#allocation2 + $0x6] sm:$0x3f]  ;;  %s1541_s15 = sld [smem:[#allocation8 + $0x4f]] }
  0xc6   :  { %v1933_v53 = vld [vmem:[#allocation2 + $0x6] sm:$0x3f]  ;;  %s1573_s22 = sld [smem:[#allocation8 + $0x5f]] }
  0xc7   :  { %s1556_s1 = sld [smem:[#allocation8 + $0x57]] }
  0xc8   :  { %618 = vrot.lane.b32.xlu0 %v616_v31, %s1717_s16  ;;  %v1149_v31 = vmul.f32 %v1148_v28, %v1883_v60  ;;  %v1218_v23 = vstv %s1586_s14  ;;  %s1587_s23 = sld [smem:[#allocation8 + $0x52]]  ;;  %v1963_v28 = vld [vmem:[#allocation2 + $0x6] sm:$0x3f] }
  0xc9   :  { %453 = vrot.lane.b32.xlu1 %v451_v33, %s1719_s0  ;;  %v676_v33 = vmul.f32 %v675_v30, %v1909_v29  ;;  %v1373_v30 = vstv %s1600_s17  ;;  %s1570_s24 = sld [smem:[#allocation8 + $0x4a]] }
  0xca   :  { %s1601_s25 = sld [smem:[#allocation8 + $0x45]] }
  0xcb   :  { %v705_v25 = vstv %s1541_s15  ;;  %s1584_s26 = sld [smem:[#allocation8 + $0x3d]] }
  0xcc   :  { %771 = vrot.lane.b32.xlu0 %v769_v37, %s1714_s9  ;;  %v1304_v37 = vmul.f32 %v1303_v35, %v1897_v14  ;;  %v1374_v35 = vmul.f32 %v1373_v30, %v1963_v28  ;;  %s2027_s14 = sld [smem:[#allocation8 + $0x5a]] }
  0xcd   :  { %608 = vrot.lane.b32.xlu1 %v606_v38, %s1716_s13  ;;  %v531_v38 = vmul.f32 %v530_v36, %v1903_v24  ;;  %s2031_s15 = sld [smem:[#allocation8 + $0x3]] }
  0xce   :  { %s2033_s17 = sld [smem:[#allocation8 + $0x4]] }
  0xd0   :  { %628 = vrot.lane.b32.xlu0 %v626_v41, %s1719_s0  ;;  %v1159_v41 = vmul.f32 %v1158_v39, %v1883_v60 }
  0xd1   :  { %761 = vrot.lane.b32.xlu1 %v759_v42, %s1715_s10  ;;  %v686_v42 = vmul.f32 %v685_v40, %v1909_v29 }
  0xd4   :  { %781 = vrot.lane.b32.xlu0 %v779_v45, %s1716_s13  ;;  %v1314_v45 = vmul.f32 %v1313_v43, %v1897_v14  ;;  %v1043_v43 = vstv %s1570_s24  ;;  %s2061_s24 = sld [smem:[#allocation8 + $0x23]] }
  0xd5   :  { %638 = vrot.lane.b32.xlu1 %v636_v46, %s1718_s21  ;;  %v716_v46 = vmul.f32 %v715_v44, %v1909_v29 }
  0xd8   :  { %936 = vrot.lane.b32.xlu0 %v934_v50, %s1715_s10  ;;  %v500_v50 = vstv %s1522_s27  ;;  %s1588_s27 = sld [smem:[#allocation8 + $0x59]] }
  0xd9   :  { %791 = vrot.lane.b32.xlu1 %v789_v51, %s1717_s16  ;;  %v869_v51 = vmul.f32 %v868_v49, %v1927_v48  ;;  %v501_v52 = vmul.f32 %v500_v50, %v1903_v24  ;;  %v1044_v49 = vmul.f32 %v1043_v43, %v1933_v53  ;;  %v1383_v50 = vstv %s1601_s25  ;;  %s2065_s25 = sld [smem:[#allocation8 + $0x38]] }
  0xdc   :  { %811 = vrot.lane.b32.xlu0 %v809_v54, %s1718_s21  ;;  %v1023_v54 = vstv %s1568_s28  ;;  %s1557_s28 = sld [smem:[#allocation8 + $0x5e]] }
  0xdd   :  { %946 = vrot.lane.b32.xlu1 %v944_v55, %s1714_s9  ;;  %v510_v55 = vstv %s1523_s29  ;;  %v1024_v56 = vmul.f32 %v1023_v54, %v1933_v53  ;;  %s1602_s29 = sld [smem:[#allocation8 + $0x4c]] }
  0xde   :  { %v511_v57 = vmul.f32 %v510_v55, %v1903_v24  ;;  %v1384_v55 = vmul.f32 %v1383_v50, %v1963_v28 }
  0xe0   :  { %966 = vrot.lane.b32.xlu0 %v964_v58, %s1717_s16  ;;  %v725_v58 = vstv %s1543_s30  ;;  %s1571_s30 = sld [smem:[#allocation8 + $0x51]] }
  0xe1   :  { %801 = vrot.lane.b32.xlu1 %v799_v59, %s1719_s0  ;;  %v540_v59 = vstv %s1526_s4  ;;  %v726_v63 = vmul.f32 %v725_v58, %v1909_v29  ;;  %s1993_s4 = sld [smem:[#allocation8 + $0x60]] }
  0xe2   :  { %v541_v0 = vmul.f32 %v540_v59, %v1903_v24  ;;  %v898_v58 = vstv %s1557_s28  ;;  %s2080_s28 = sld [smem:[#allocation8 + $0x46]] }
  0xe4   :  { %1121 = vrot.lane.b32.xlu0 %v1119_v1, %s1714_s9  ;;  %v878_v1 = vstv %s1555_s5  ;;  %s1995_s5 = sld [smem:[#allocation8 + $0x44]] }
  0xe5   :  { %956 = vrot.lane.b32.xlu1 %v954_v2, %s1716_s13  ;;  %v695_v2 = vstv %s1540_s6  ;;  %v879_v3 = vmul.f32 %v878_v1, %v1927_v48  ;;  %v899_v1 = vmul.f32 %v898_v58, %v1927_v48  ;;  %s2005_s6 = sld [smem:[#allocation8 + $0x29]] }
  0xe6   :  { %v696_v4 = vmul.f32 %v695_v2, %v1909_v29  ;;  %v1393_v2 = vstv %s1602_s29  ;;  %s2084_s29 = sld [smem:[#allocation8 + $0x4d]] }
  0xe8   :  { %976 = vrot.lane.b32.xlu0 %v974_v9, %s1719_s0  ;;  %v1033_v9 = vstv %s1569_s7  ;;  %s2007_s7 = sld [smem:[#allocation8 + $0x53]] }
  0xe9   :  { %1111 = vrot.lane.b32.xlu1 %v1109_v10, %s1715_s10  ;;  %v848_v10 = vstv %s1552_s8  ;;  %v1034_v11 = vmul.f32 %v1033_v9, %v1933_v53  ;;  %s2009_s8 = sld [smem:[#allocation8 + $0x1]] }
  0xea   :  { %v849_v12 = vmul.f32 %v848_v10, %v1927_v48  ;;  %v1394_v10 = vmul.f32 %v1393_v2, %v1963_v28 }
  0xeb   :  { %v1323_v30 = vstv %s2005_s6  ;;  %s1521_s6 = sld [smem:[#allocation8 + $0x32]] }
  0xec   :  { %1131 = vrot.lane.b32.xlu0 %v1129_v13, %s1716_s13  ;;  %v1063_v13 = vstv %s1572_s11  ;;  %s2013_s11 = sld [smem:[#allocation8 + $0x2]] }
  0xed   :  { %986 = vrot.lane.b32.xlu1 %v984_v8, %s1718_s21  ;;  %v550_v8 = vstv %s1527_s12  ;;  %v1064_v19 = vmul.f32 %v1063_v13, %v1933_v53  ;;  %s2021_s12 = sld [smem:[#allocation8 + $0x30]]  ;;  %v1266_v13 = vadd.s32 3, %v1769_v22 }
  0xef   :  { %vm1270_vm5 = vcmp.lt.s32.totalorder %v1266_v13, 16 }
  0xf0   :  { %1286 = vrot.lane.b32.xlu0 %v1284_v20, %s1715_s10  ;;  %v551_v20 = vmul.f32 %v550_v8, %v1903_v24  ;;  %v1248_v8 = vstv %s1993_s4  ;;  %s1720_s4 = smov 6  }
  0xf1   :  { %1141 = vrot.lane.b32.xlu1 %v1139_v21, %s1717_s16  ;;  %v1957_v21 = vld [vmem:[#allocation2 + $0x6] sm:$0x3f] }
  0xf2   :  { %v581_v2 = vstv %s2013_s11  ;;  %s1551_s11 = sld [smem:[#allocation8 + $0x34]] }
  0xf4   :  { %523 = vrot.lane.b32.xlu0 %v521_v27, %s1716_s13  ;;  %v706_v27 = vmul.f32 %v705_v25, %v1909_v29  ;;  %v1249_v25 = vmul.f32 %v1248_v8, %v1957_v21  ;;  %v929_v8 = vstv %s2033_s17  ;;  %s1726_s17 = smov 122  }
  0xf5   :  { %1296 = vrot.lane.b32.xlu1 %v1294_v26, %s1714_s9  ;;  %v1219_v26 = vmul.f32 %v1218_v23, %v1957_v21 }
  0xf8   :  { %678 = vrot.lane.b32.xlu0 %v676_v33, %s1715_s10  ;;  %v1965_v33 = vpop.permute.xlu1 %1002 }
  0xf9   :  { %1151 = vrot.lane.b32.xlu1 %v1149_v31, %s1719_s0  ;;  %v858_v31 = vstv %s1553_s20  ;;  %s2041_s20 = sld [smem:[#allocation8 + $0xe]] }
  0xfa   :  { %v859_v36 = vmul.f32 %v858_v31, %v1927_v48 }
  0xfc   :  { %533 = vrot.lane.b32.xlu0 %v531_v38, %s1717_s16  ;;  %v888_v38 = vstv %s1556_s1  ;;  %v1973_v39 = vpop.permute.xlu1 %1177  ;;  %s2049_s1 = sld [smem:[#allocation8 + $0x15]] }
  0xfd   :  { %1306 = vrot.lane.b32.xlu1 %v1304_v37, %s1716_s13  ;;  %v1073_v37 = vstv %s1573_s22  ;;  %s2045_s22 = sld [smem:[#allocation8 + $0x61]] }
  0xfe   :  { %v1074_v40 = vmul.f32 %v1073_v37, %v1933_v53 }
 0x100   :  { %688 = vrot.lane.b32.xlu0 %v686_v42, %s1714_s9  ;;  %v1228_v42 = vstv %s1587_s23  ;;  %s2053_s23 = sld [smem:[#allocation8 + $0x1c]] }
 0x101   :  { %1161 = vrot.lane.b32.xlu1 %v1159_v41, %s1718_s21  ;;  %v889_v41 = vmul.f32 %v888_v38, %v1927_v48 }
 0x104   :  { %718 = vrot.lane.b32.xlu0 %v716_v46, %s1719_s0  ;;  %v1229_v46 = vmul.f32 %v1228_v42, %v1957_v21  ;;  %v1333_v42 = vstv %s2021_s12  ;;  %s1567_s12 = sld [smem:[#allocation8 + $0x35]] }
 0x105   :  { %1316 = vrot.lane.b32.xlu1 %v1314_v45, %s1717_s16 }
 0x108   :  { %871 = vrot.lane.b32.xlu0 %v869_v51, %s1716_s13  ;;  %v1198_v51 = vstv %s1584_s26  ;;  %s2069_s26 = sld [smem:[#allocation8 + $0x2a]] }
 0x109   :  { %503 = vrot.lane.b32.xlu1 %v501_v52, %s1715_s10 }
 0x10c   :  { %1026 = vrot.lane.b32.xlu0 %v1024_v56, %s1715_s10  ;;  %v1199_v56 = vmul.f32 %v1198_v51, %v1957_v21 }
 0x10d   :  { %513 = vrot.lane.b32.xlu1 %v511_v57, %s1714_s9  ;;  %v1238_v57 = vstv %s1588_s27  ;;  %s2072_s27 = sld [smem:[#allocation8 + $0x3f]] }
 0x110   :  { %728 = vrot.lane.b32.xlu0 %v726_v63, %s1718_s21 }
 0x111   :  { %543 = vrot.lane.b32.xlu1 %v541_v0, %s1719_s0  ;;  %v1239_v0 = vmul.f32 %v1238_v57, %v1957_v21  ;;  %v1423_v57 = vstv %s2045_s22  ;;  %s1505_s22 = sld [smem:[#allocation8 + $0x31]] }
 0x114   :  { %881 = vrot.lane.b32.xlu0 %v879_v3, %s1717_s16  ;;  %v1053_v3 = vstv %s1571_s30  ;;  %s2089_s30 = sld [smem:[#allocation8 + $0x54]] }
 0x115   :  { %698 = vrot.lane.b32.xlu1 %v696_v4, %s1716_s13 }
 0x118   :  { %1036 = vrot.lane.b32.xlu0 %v1034_v11, %s1714_s9  ;;  %v1054_v11 = vmul.f32 %v1053_v3, %v1933_v53  ;;  %v754_v3 = vstv %s2031_s15  ;;  %s2329_s15 = sld [smem:[#allocation8 + $0x37]] }
 0x119   :  { %851 = vrot.lane.b32.xlu1 %v849_v12, %s1715_s10  ;;  %v1265_v12 = vadd.s32 3, %v1762_v15 }
 0x11b   :  { %vm1269_vm4 = vcmp.lt.s32.totalorder %v1265_v12, 16  ;;  %v1424_v12 = vmul.f32 %v1423_v57, %v1963_v28 }
 0x11c   :  { %1066 = vrot.lane.b32.xlu0 %v1064_v19, %s1719_s0  ;;  %v1208_v19 = vstv %s1995_s5  ;;  %v1590_v31 = vsel %vm1269_vm4, 1.0, %v1708_v32  ;;  %s1724_s5 = smov 124   ;;  %vm490_vm4 = vcmask 1039360  }
 0x11d   :  { %553 = vrot.lane.b32.xlu1 %v551_v20, %s1718_s21 }
 0x120   :  { %1221 = vrot.lane.b32.xlu0 %v1219_v26, %s1716_s13  ;;  %v1209_v26 = vmul.f32 %v1208_v19, %v1957_v21  ;;  %v257_v19 = vstv %s2041_s20  ;;  %s239_s20 = sld [smem:[#allocation8]] }
 0x121   :  { %708 = vrot.lane.b32.xlu1 %v706_v27, %s1717_s16  ;;  %v1403_v27 = vstv %s2007_s7  ;;  %s1725_s7 = smov 123  }
 0x122   :  { %v1404_v38 = vmul.f32 %v1403_v27, %v1963_v28  ;;  %v279_v27 = vstv %s2053_s23 }
 0x124   :  { %1376 = vrot.lane.b32.xlu0 %v1374_v35, %s1715_s10  ;;  %v1591_v35 = vsel %vm1270_vm5, 1.0, %v1708_v32  ;;  %vm665_vm5 = vcmask 1031168  }
 0x125   :  { %861 = vrot.lane.b32.xlu1 %v859_v36, %s1714_s9  ;;  %v1344_v43 = vcombine.low %v1590_v31, %v1591_v35  ;;  %v341_v31 = vstv %s2072_s27  ;;  %v290_v35 = vstv %s2061_s24 }
 0x127   :  { %v1351_v58 = vrot.slane %v1344_v43, %v1766_v18  ;;  %v258_v43 = vmul.f32 %v257_v19, %v1827_v7 }
 0x128   :  { %1076 = vrot.lane.b32.xlu0 %v1074_v40, %s1718_s21  ;;  %v1324_v40 = vmul.f32 %v1323_v30, %v1897_v14 }
 0x129   :  { %891 = vrot.lane.b32.xlu1 %v889_v41, %s1719_s0  ;;  %v1413_v41 = vstv %s2027_s14  ;;  %s2324_s14 = sld [smem:[#allocation8 + $0x36]] }
 0x12a   :  { %v1981_v45 = vpop.permute.xlu0 %423  ;;  %v1414_v51 = vmul.f32 %v1413_v41, %v1963_v28 }
 0x12b   :  { %v1979_v44 = vpop.permute.xlu1 %249  ;;  %v425_v13 = vrot.slane %v1981_v45, 2 }
 0x12c   :  { %1231 = vrot.lane.b32.xlu0 %v1229_v46, %s1717_s16 }
 0x12d   :  { %1046 = vrot.lane.b32.xlu1 %v1044_v49, %s1716_s13 }
 0x12e   :  { %v1989_v54 = vpop.permute.xlu0 %433 }
 0x12f   :  { %v1987_v52 = vpop.permute.xlu1 %413 }
 0x130   :  { %1386 = vrot.lane.b32.xlu0 %v1384_v55, %s1714_s9  ;;  %v415_v46 = vrot.slane %v1987_v52, 2  ;;  %v1334_v55 = vmul.f32 %v1333_v42, %v1897_v14 }
 0x131   :  { %1201 = vrot.lane.b32.xlu1 %v1199_v56, %s1715_s10  ;;  %v406_v56 = vstv %s2009_s8  ;;  %s1537_s8 = sld [smem:[#allocation8 + $0x33]] }
 0x132   :  { %v2001_v63 = vpop.permute.xlu0 %588 }
 0x133   :  { %v1999_v59 = vpop.permute.xlu1 %443  ;;  %v590_v30 = vrot.slane %v2001_v63, 2 }
 0x134   :  { %1241 = vrot.lane.b32.xlu0 %v1239_v0, %s1719_s0  ;;  %v416_v0 = vsel %vm252_vm7, %v1987_v52, %v415_v46  ;;  %v2104_v52 = vld [vmem:[#allocation2 + $0x6] sm:$0x3f] }
 0x135   :  { %901 = vrot.lane.b32.xlu1 %v899_v1, %s1718_s21  ;;  %v407_v1 = vmul.f32 %v406_v56, %v1825_v6  ;;  %v331_v6 = vstv %s2065_s25  ;;  %v591_v19 = vsel %vm252_vm7, %v2001_v63, %v590_v30 }
 0x136   :  { %v2017_v9 = vpop.permute.xlu0 %463  ;;  %v332_v46 = vmul.f32 %v331_v6, %v2104_v52 }
 0x137   :  { %v2015_v4 = vpop.permute.xlu1 %598 }
 0x138   :  { %1396 = vrot.lane.b32.xlu0 %v1394_v10, %s1716_s13  ;;  %v600_v56 = vrot.slane %v2015_v4, 2 }
 0x139   :  { %1056 = vrot.lane.b32.xlu1 %v1054_v11, %s1717_s16 }
 0x13a   :  { %v2037_v23 = vpop.permute.xlu0 %618  ;;  %v601_v63 = vsel %vm263_vm8, %v2015_v4, %v600_v56 }
 0x13b   :  { %v2035_v20 = vpop.permute.xlu1 %453 }
 0x13c   :  { %1251 = vrot.lane.b32.xlu0 %v1249_v25, %s1718_s21  ;;  %v418_v25 = vadd.f32 %v416_v0, %v407_v1  ;;  %v361_v0 = vstv %s2084_s29  ;;  %v371_v1 = vstv %s2089_s30 }
 0x13d   :  { %1211 = vrot.lane.b32.xlu1 %v1209_v26, %s1714_s9  ;;  %v268_v26 = vstv %s2049_s1 }
 0x13e   :  { %v2057_v37 = vpop.permute.xlu0 %771 }
 0x13f   :  { %v2055_v36 = vpop.permute.xlu1 %608 }
 0x140   :  { %1406 = vrot.lane.b32.xlu0 %v1404_v38, %s1717_s16  ;;  %v301_v38 = vstv %s2069_s26 }
 0x141   :  { %1326 = vrot.lane.b32.xlu1 %v1324_v40, %s1719_s0  ;;  %v435_v40 = vrot.slane %v1989_v54, 2 }
 0x142   :  { %v2076_v50 = vpop.permute.xlu0 %628 }
 0x143   :  { %v2074_v49 = vpop.permute.xlu1 %761  ;;  %v436_v6 = vsel %vm274_vm9, %v1989_v54, %v435_v40 }
 0x144   :  { %1416 = vrot.lane.b32.xlu0 %v1414_v51, %s1719_s0  ;;  %v351_v51 = vstv %s2080_s28  ;;  %v763_v57 = vrot.slane %v2074_v49, 2 }
 0x145   :  { %1336 = vrot.lane.b32.xlu1 %v1334_v55, %s1718_s21  ;;  %v426_v55 = vsel %vm263_vm8, %v1981_v45, %v425_v13  ;;  %v610_v45 = vrot.slane %v2055_v36, 2  ;;  %v755_v13 = vmul.f32 %v754_v3, %v1855_v34  ;;  %v455_v34 = vrot.slane %v2035_v20, 2 }
 0x146   :  { %v2098_v11 = vpop.permute.xlu0 %781  ;;  %v764_v54 = vsel %vm252_vm7, %v2074_v49, %v763_v57  ;;  %v620_v49 = vrot.slane %v2037_v23, 2 }
 0x147   :  { %v2096_v10 = vpop.permute.xlu1 %638  ;;  %v766_v56 = vadd.f32 %v764_v54, %v755_v13 }
 0x148   :  { %1426 = vrot.lane.b32.xlu0 %v1424_v12, %s1718_s21  ;;  %v582_v12 = vmul.f32 %v581_v2, %v1837_v17  ;;  %v342_v17 = vmul.f32 %v341_v31, %v2104_v52  ;;  %v445_v2 = vrot.slane %v1999_v59, 2  ;;  %v291_v31 = vmul.f32 %v290_v35, %v1827_v7 }
 0x149   :  { %1352 = vrot.lane.b32.xlu1 %v1351_v58, %s1720_s4  ;;  %v428_v58 = vadd.f32 %v426_v55, %v418_v25  ;;  %v930_v25 = vmul.f32 %v929_v8, %v1869_v47  ;;  %v280_v47 = vmul.f32 %v279_v27, %v1827_v7  ;;  %v611_v8 = vsel %vm274_vm9, %v2055_v36, %v610_v45 }
 0x14a   :  { %v937_v42 = vpop.permute.xlu0 %936  ;;  %v593_v30 = vadd.f32 %v591_v19, %v582_v12  ;;  %v352_v12 = vmul.f32 %v351_v51, %v2104_v52  ;;  %v446_v27 = vsel %vm285_vm10, %v1999_v59, %v445_v2  ;;  %v456_v36 = vsel %vm296_vm12, %v2035_v20, %v455_v34 }
 0x14b   :  { %v2115_v41 = vpop.permute.xlu1 %791  ;;  %v438_v3 = vadd.f32 %v436_v6, %v428_v58  ;;  %v938_v4 = vrot.slane %v937_v42, 2  ;;  %v783_v19 = vrot.slane %v2098_v11, 2  ;;  %v465_v6 = vrot.slane %v2017_v9, 2 }
 0x14c   :  { %334 = vrot.lane.b32.xlu0 %v332_v46, %s1715_s10  ;;  %v269_v46 = vmul.f32 %v268_v26, %v1827_v7  ;;  %v773_v26 = vrot.slane %v2057_v37, 2  ;;  %v603_v40 = vadd.f32 %v601_v63, %v593_v30  ;;  %v362_v51 = vmul.f32 %v361_v0, %v2104_v52  ;;  %s2187_s10 = sld [smem:[#allocation8 + $0x6]] }
 0x14d   :  { %260 = vrot.lane.b32.xlu1 %v258_v43, %s1714_s9  ;;  %v448_v35 = vadd.f32 %v446_v27, %v438_v3  ;;  %v630_v20 = vrot.slane %v2076_v50, 2  ;;  %v621_v63 = vsel %vm285_vm10, %v2037_v23, %v620_v49  ;;  %v640_v34 = vrot.slane %v2096_v10, 2 }
 0x14e   :  { %v2136_v55 = vpop.permute.xlu0 %811  ;;  %v613_v13 = vadd.f32 %v611_v8, %v603_v40  ;;  %v774_v59 = vsel %vm263_vm8, %v2057_v37, %v773_v26  ;;  %v784_v37 = vsel %vm274_vm9, %v2098_v11, %v783_v19  ;;  %v302_v23 = vmul.f32 %v301_v38, %v1827_v7 }
 0x14f   :  { %v947_v43 = vpop.permute.xlu1 %946  ;;  %v458_v2 = vadd.f32 %v456_v36, %v448_v35  ;;  %v776_v54 = vadd.f32 %v774_v59, %v766_v56  ;;  %v466_v11 = vsel %vm307_vm11, %v2017_v9, %v465_v6  ;;  %v372_v7 = vmul.f32 %v371_v1, %v2104_v52 }
 0x150   :  { %344 = vrot.lane.b32.xlu0 %v342_v17, %s1714_s9  ;;  %v948_v45 = vrot.slane %v947_v43, 2  ;;  %s2162_s9 = sld [smem:[#allocation8 + $0x5b]]  ;;  %v939_v17 = vsel %vm252_vm7, %v937_v42, %v938_v4  ;;  %v481_v42 = vrot.slane %v1816_v62, 6  ;;  %v623_v26 = vadd.f32 %v621_v63, %v613_v13 }
 0x151   :  { %271 = vrot.lane.b32.xlu1 %v269_v46, %s1716_s13  ;;  %v793_v46 = vrot.slane %v2115_v41, 2  ;;  %v941_v4 = vadd.f32 %v939_v17, %v930_v25  ;;  %v786_v49 = vadd.f32 %v784_v37, %v776_v54  ;;  %v641_v38 = vsel %vm307_vm11, %v2096_v10, %v640_v34 }
 0x152   :  { %v2154_v58 = vpop.permute.xlu0 %966  ;;  %v949_v0 = vsel %vm263_vm8, %v947_v43, %v948_v45  ;;  %v631_v43 = vsel %vm296_vm12, %v2076_v50, %v630_v20  ;;  %v2210_v1 = vsel %vm482_vm13, %v481_v42, %v1816_v62  ;;  %v656_v10 = vrot.slane %v1953_v16, 6 }
 0x153   :  { %v802_v57 = vpop.permute.xlu1 %801  ;;  %v794_v40 = vsel %vm285_vm10, %v2115_v41, %v793_v46  ;;  %v951_v56 = vadd.f32 %v949_v0, %v941_v4  ;;  %v968_v50 = vrot.slane %v2154_v58, 2  ;;  %v633_v36 = vadd.f32 %v631_v43, %v623_v26 }
 0x154   :  { %354 = vrot.lane.b32.xlu0 %v352_v12, %s1716_s13  ;;  %s2203_s13 = sld [smem:[#allocation8 + $0x5]]  ;;  %v796_v19 = vadd.f32 %v794_v40, %v786_v49  ;;  %v829_v62 = vrot.slane %v1814_v61, 6  ;;  %v1279_v34 = vstv %s2187_s10 }
 0x155   :  { %282 = vrot.lane.b32.xlu1 %v280_v47, %s1717_s16  ;;  %v803_v47 = vrot.slane %v802_v57, 2  ;;  %v643_v6 = vadd.f32 %v641_v38, %v633_v36  ;;  %v969_v17 = vsel %vm285_vm10, %v2154_v58, %v968_v50 }
 0x156   :  { %v2176_v30 = vpop.permute.xlu0 %1121  ;;  %v381_v41 = vstv %s2162_s9 }
 0x157   :  { %v957_v3 = vpop.permute.xlu1 %956  ;;  %v804_v9 = vsel %vm296_vm12, %v802_v57, %v803_v47  ;;  %v813_v57 = vrot.slane %v2136_v55, 2  ;;  %v382_v20 = vmul.f32 %v381_v41, %v2104_v52  ;;  %v2224_v52 = vsel %vm657_vm14, %v656_v10, %v1953_v16 }
 0x158   :  { %v958_v8 = vrot.slane %v957_v3, 2  ;;  %364 = vrot.lane.b32.xlu0 %v362_v51, %s1717_s16  ;;  %v806_v13 = vadd.f32 %v804_v9, %v796_v19  ;;  %s1721_s16 = smov 127  }
 0x159   :  { %293 = vrot.lane.b32.xlu1 %v291_v31, %s1719_s0  ;;  %v468_v31 = vadd.f32 %v466_v11, %v458_v2  ;;  %v814_v54 = vsel %vm307_vm11, %v2136_v55, %v813_v57  ;;  %v1280_v11 = vmul.f32 %v1279_v34, %v1897_v14  ;;  %v1004_v55 = vrot.slane %v1965_v33, 6 }
 0x15a   :  { %v959_v25 = vsel %vm274_vm9, %v957_v3, %v958_v8  ;;  %v977_v27 = vpop.permute.xlu0 %976  ;;  %v816_v37 = vadd.f32 %v814_v54, %v806_v13  ;;  %v660_v8 = vmul.f32 %v2224_v52, %v643_v6  ;;  %v1104_v42 = vstv %s2203_s13 }
 0x15b   :  { %v1112_v12 = vpop.permute.xlu1 %1111  ;;  %v961_v45 = vadd.f32 %v959_v25, %v951_v56  ;;  %v978_v35 = vrot.slane %v977_v27, 2  ;;  %v485_v46 = vmul.f32 %v2210_v1, %v468_v31  ;;  %v1105_v25 = vmul.f32 %v1104_v42, %v1883_v60 }
 0x15c   :  { %374 = vrot.lane.b32.xlu0 %v372_v7, %s1719_s0  ;;  %v1113_v58 = vrot.slane %v1112_v12, 2  ;;  %v1123_v14 = vrot.slane %v2176_v30, 2  ;;  %s1723_s0 = smov 125   ;;  %v1179_v54 = vrot.slane %v1973_v39, 6 }
 0x15d   :  { %304 = vrot.lane.b32.xlu1 %v302_v23, %s1718_s21  ;;  %v971_v63 = vadd.f32 %v969_v17, %v961_v45  ;;  %v979_v3 = vsel %vm296_vm12, %v977_v27, %v978_v35  ;;  %v2234_v23 = vsel %vm830_vm15, %v829_v62, %v1814_v61 }
 0x15e   :  { %v1132_v59 = vpop.permute.xlu0 %1131  ;;  %v1114_v43 = vsel %vm252_vm7, %v1112_v12, %v1113_v58  ;;  %v833_v27 = vmul.f32 %v2234_v23, %v816_v37  ;;  %v2248_v12 = vsel %vm1005_vm0, %v1004_v55, %v1965_v33  ;;  %v1124_v45 = vsel %vm263_vm8, %v2176_v30, %v1123_v14 }
 0x15f   :  { %v987_v51 = vpop.permute.xlu1 %986  ;;  %v981_v16 = vadd.f32 %v979_v3, %v971_v63  ;;  %v1116_v38 = vadd.f32 %v1114_v43, %v1105_v25  ;;  %v1133_v9 = vrot.slane %v1132_v59, 2 }
 0x160   :  { %v988_v2 = vrot.slane %v987_v51, 2  ;;  %487 = vrot.lane.b32.xlu0 %v485_v46, %s1721_s16 }
 0x161   :  { %384 = vrot.lane.b32.xlu1 %v382_v20, %s1718_s21  ;;  %s1722_s21 = smov 126   ;;  %v1126_v57 = vadd.f32 %v1124_v45, %v1116_v38  ;;  %v1134_v33 = vsel %vm274_vm9, %v1132_v59, %v1133_v9 }
 0x162   :  { %v1287_v47 = vpop.permute.xlu0 %1286  ;;  %v989_v26 = vsel %vm307_vm11, %v987_v51, %v988_v2 }
 0x163   :  { %v1142_v0 = vpop.permute.xlu1 %1141  ;;  %v1288_v4 = vrot.slane %v1287_v47, 2  ;;  %v991_v31 = vadd.f32 %v989_v26, %v981_v16  ;;  %v1136_v46 = vadd.f32 %v1134_v33, %v1126_v57 }
 0x164   :  { %662 = vrot.lane.b32.xlu0 %v660_v8, %s1722_s21  ;;  %v1143_v10 = vrot.slane %v1142_v0, 2  ;;  %v2266_v8 = vsel %vm1180_vm1, %v1179_v54, %v1973_v39 }
 0x165   :  { %v1289_v40 = vsel %vm252_vm7, %v1287_v47, %v1288_v4  ;;  %v1008_v50 = vmul.f32 %v2248_v12, %v991_v31 }
 0x166   :  { %v1291_v49 = vadd.f32 %v1289_v40, %v1280_v11  ;;  %v2242_v61 = vpop.permute.xlu0 %523  ;;  %v1144_v51 = vsel %vm285_vm10, %v1142_v0, %v1143_v10  ;;  %v496_v40 = vstv %s1521_s6 }
 0x167   :  { %v1297_v56 = vpop.permute.xlu1 %1296  ;;  %v1146_v62 = vadd.f32 %v1144_v51, %v1136_v46  ;;  %v525_v9 = vrot.slane %v2242_v61, 2 }
 0x168   :  { %v1298_v7 = vrot.slane %v1297_v56, 2  ;;  %835 = vrot.lane.b32.xlu0 %v833_v27, %s1723_s0 }
 0x16a   :  { %v1299_v60 = vsel %vm263_vm8, %v1297_v56, %v1298_v7  ;;  %v2252_v19 = vpop.permute.xlu0 %678  ;;  %v497_v56 = vmul.f32 %v496_v40, %v1903_v24 }
 0x16b   :  { %v1301_v41 = vadd.f32 %v1299_v60, %v1291_v49  ;;  %v1152_v36 = vpop.permute.xlu1 %1151  ;;  %v680_v57 = vrot.slane %v2252_v19, 2 }
 0x16c   :  { %1010 = vrot.lane.b32.xlu0 %v1008_v50, %s1724_s5  ;;  %v1153_v35 = vrot.slane %v1152_v36, 2 }
 0x16e   :  { %v534_v13 = vpop.permute.xlu0 %533  ;;  %v1154_v17 = vsel %vm296_vm12, %v1152_v36, %v1153_v35  ;;  %v526_v36 = vsel %vm274_vm9, %v2242_v61, %v525_v9  ;;  %v671_v35 = vstv %s1537_s8 }
 0x16f   :  { %v1307_v6 = vpop.permute.xlu1 %1306  ;;  %v1156_v59 = vadd.f32 %v1154_v17, %v1146_v62  ;;  %v535_v45 = vrot.slane %v534_v13, 2  ;;  %v681_v17 = vsel %vm252_vm7, %v2252_v19, %v680_v57  ;;  %v672_v61 = vmul.f32 %v671_v35, %v1909_v29 }
 0x170   :  { %v1308_v20 = vrot.slane %v1307_v6, 2 }
 0x172   :  { %v1309_v2 = vsel %vm274_vm9, %v1307_v6, %v1308_v20  ;;  %v689_v34 = vpop.permute.xlu0 %688  ;;  %v536_v6 = vsel %vm285_vm10, %v534_v13, %v535_v45 }
 0x173   :  { %v1311_v30 = vadd.f32 %v1309_v2, %v1301_v41  ;;  %v1162_v63 = vpop.permute.xlu1 %1161  ;;  %v690_v51 = vrot.slane %v689_v34, 2 }
 0x174   :  { %v1163_v58 = vrot.slane %v1162_v63, 2 }
 0x176   :  { %v1164_v3 = vsel %vm307_vm11, %v1162_v63, %v1163_v58  ;;  %v2263_v47 = vpop.permute.xlu0 %718  ;;  %v691_v63 = vsel %vm263_vm8, %v689_v34, %v690_v51 }
 0x177   :  { %v1166_v37 = vadd.f32 %v1164_v3, %v1156_v59  ;;  %v1317_v0 = vpop.permute.xlu1 %1316  ;;  %v683_v59 = vadd.f32 %v681_v17, %v672_v61  ;;  %v720_v29 = vrot.slane %v2263_v47, 2 }
 0x178   :  { %v1318_v42 = vrot.slane %v1317_v0, 2 }
 0x179   :  { %v1183_v26 = vmul.f32 %v2266_v8, %v1166_v37 }
 0x17a   :  { %v1319_v4 = vsel %vm285_vm10, %v1317_v0, %v1318_v42  ;;  %v2273_v55 = vpop.permute.xlu0 %871  ;;  %v693_v0 = vadd.f32 %v691_v63, %v683_v59 }
 0x17b   :  { %v2270_v16 = vadd.f32 %v1319_v4, %v1311_v30  ;;  %v504_v11 = vpop.permute.xlu1 %503  ;;  %1185 = vrot.lane.b32.xlu0 %v1183_v26, %s1725_s7 }
 0x17c   :  { %v505_v43 = vrot.slane %v504_v11, 2 }
 0x17e   :  { %v2275_v31 = vpop.permute.xlu0 %1026  ;;  %v506_v39 = vsel %vm252_vm7, %v504_v11, %v505_v43 }
 0x17f   :  { %v514_v25 = vpop.permute.xlu1 %513  ;;  %v508_v14 = vadd.f32 %v506_v39, %v497_v56  ;;  %v1028_v17 = vrot.slane %v2275_v31, 2 }
 0x180   :  { %v515_v49 = vrot.slane %v514_v25, 2 }
 0x182   :  { %v516_v27 = vsel %vm263_vm8, %v514_v25, %v515_v49  ;;  %v729_v38 = vpop.permute.xlu0 %728  ;;  %v844_v25 = vstv %s1551_s11 }
 0x183   :  { %v544_v7 = vpop.permute.xlu1 %543  ;;  %v518_v60 = vadd.f32 %v516_v27, %v508_v14  ;;  %v730_v40 = vrot.slane %v729_v38, 2  ;;  %v721_v14 = vsel %vm296_vm12, %v2263_v47, %v720_v29 }
 0x184   :  { %v545_v20 = vrot.slane %v544_v7, 2 }
 0x185   :  { %v528_v10 = vadd.f32 %v526_v36, %v518_v60  ;;  %v845_v60 = vmul.f32 %v844_v25, %v1927_v48 }
 0x186   :  { %v2281_v41 = vpop.permute.xlu0 %881  ;;  %v546_v54 = vsel %vm296_vm12, %v544_v7, %v545_v20 }
 0x187   :  { %v699_v50 = vpop.permute.xlu1 %698  ;;  %v538_v46 = vadd.f32 %v536_v6, %v528_v10  ;;  %v873_v6 = vrot.slane %v2273_v55, 2 }
 0x188   :  { %v700_v2 = vrot.slane %v699_v50, 2 }
 0x189   :  { %v548_v13 = vadd.f32 %v546_v54, %v538_v46  ;;  %v874_v48 = vsel %vm274_vm9, %v2273_v55, %v873_v6  ;;  %v1029_v55 = vsel %vm252_vm7, %v2275_v31, %v1028_v17 }
 0x18a   :  { %v2286_v33 = vpop.permute.xlu0 %1036  ;;  %v701_v3 = vsel %vm274_vm9, %v699_v50, %v700_v2 }
 0x18b   :  { %v852_v24 = vpop.permute.xlu1 %851  ;;  %v703_v43 = vadd.f32 %v701_v3, %v693_v0 }
 0x18c   :  { %v853_v4 = vrot.slane %v852_v24, 2 }
 0x18e   :  { %v2292_v30 = vpop.permute.xlu0 %1066  ;;  %v854_v7 = vsel %vm252_vm7, %v852_v24, %v853_v4 }
 0x18f   :  { %v554_v62 = vpop.permute.xlu1 %553  ;;  %v856_v45 = vadd.f32 %v854_v7, %v845_v60  ;;  %v1068_v25 = vrot.slane %v2292_v30, 2 }
 0x190   :  { %v555_v58 = vrot.slane %v554_v62, 2 }
 0x192   :  { %v556_v37 = vsel %vm307_vm11, %v554_v62, %v555_v58  ;;  %v2298_v26 = vpop.permute.xlu0 %1221  ;;  %v1019_v62 = vstv %s1567_s12 }
 0x193   :  { %v558_v19 = vadd.f32 %v556_v37, %v548_v13  ;;  %v709_v42 = vpop.permute.xlu1 %708  ;;  %v1020_v13 = vmul.f32 %v1019_v62, %v1933_v53  ;;  %v1223_v6 = vrot.slane %v2298_v26, 2 }
 0x194   :  { %v710_v11 = vrot.slane %v709_v42, 2 }
 0x195   :  { %v559_v34 = vmul.f32 %v558_v19, %v2210_v1  ;;  %v731_v1 = vsel %vm307_vm11, %v729_v38, %v730_v40  ;;  %v883_v38 = vrot.slane %v2281_v41, 2 }
 0x196   :  { %v711_v39 = vsel %vm285_vm10, %v709_v42, %v710_v11  ;;  %v2304_v27 = vpop.permute.xlu0 %1376  ;;  %v1031_v42 = vadd.f32 %v1029_v55, %v1020_v13 }
 0x197   :  { %v713_v49 = vadd.f32 %v711_v39, %v703_v43  ;;  %v862_v56 = vpop.permute.xlu1 %861  ;;  %561 = vrot.lane.b32.xlu1 %v559_v34, %s1721_s16  ;;  %v884_v63 = vsel %vm285_vm10, %v2281_v41, %v883_v38  ;;  %v1194_v39 = vstv %s2324_s14 }
 0x198   :  { %v863_v9 = vrot.slane %v862_v56, 2 }
 0x199   :  { %v723_v50 = vadd.f32 %v721_v14, %v713_v49 }
 0x19a   :  { %v864_v36 = vsel %vm263_vm8, %v862_v56, %v863_v9  ;;  %v1077_v57 = vpop.permute.xlu0 %1076 }
 0x19b   :  { %v892_v10 = vpop.permute.xlu1 %891  ;;  %v733_v35 = vadd.f32 %v731_v1, %v723_v50  ;;  %v866_v51 = vadd.f32 %v864_v36, %v856_v45  ;;  %v1078_v7 = vrot.slane %v1077_v57, 2  ;;  %v1369_v50 = vstv %s2329_s15 }
 0x19c   :  { %v893_v54 = vrot.slane %v892_v10, 2  ;;  %v1195_v1 = vmul.f32 %v1194_v39, %v1957_v21 }
 0x19d   :  { %v734_v47 = vmul.f32 %v733_v35, %v2224_v52  ;;  %v876_v46 = vadd.f32 %v874_v48, %v866_v51  ;;  %v1038_v52 = vrot.slane %v2286_v33, 2  ;;  %v1069_v35 = vsel %vm296_vm12, %v2292_v30, %v1068_v25 }
 0x19e   :  { %v2315_v24 = vpop.permute.xlu0 %1231  ;;  %v894_v0 = vsel %vm296_vm12, %v892_v10, %v893_v54  ;;  %v1079_v38 = vsel %vm307_vm11, %v1077_v57, %v1078_v7 }
 0x19f   :  { %v1047_v20 = vpop.permute.xlu1 %1046  ;;  %736 = vrot.lane.b32.xlu1 %v734_v47, %s1722_s21  ;;  %v886_v58 = vadd.f32 %v884_v63, %v876_v46  ;;  %v1039_v41 = vsel %vm263_vm8, %v2286_v33, %v1038_v52  ;;  %v1378_v33 = vrot.slane %v2304_v27, 2  ;;  %v1233_v21 = vrot.slane %v2315_v24, 2 }
 0x1a0   :  { %v1048_v59 = vrot.slane %v1047_v20, 2  ;;  %v1041_v53 = vadd.f32 %v1039_v41, %v1031_v42 }
 0x1a1   :  { %v896_v29 = vadd.f32 %v894_v0, %v886_v58  ;;  %v1379_v47 = vsel %vm252_vm7, %v2304_v27, %v1378_v33  ;;  %v1224_v58 = vsel %vm274_vm9, %v2298_v26, %v1223_v6  ;;  %v1234_v41 = vsel %vm285_vm10, %v2315_v24, %v1233_v21 }
 0x1a2   :  { %v1387_v61 = vpop.permute.xlu0 %1386  ;;  %v1049_v4 = vsel %vm274_vm9, %v1047_v20, %v1048_v59  ;;  %v228_v21 = vadd.s32 4294967293, %v1769_v22 }
 0x1a3   :  { %v1202_v2 = vpop.permute.xlu1 %1201  ;;  %v1051_v56 = vadd.f32 %v1049_v4, %v1041_v53  ;;  %v1388_v51 = vrot.slane %v1387_v61, 2 }
 0x1a4   :  { %v1203_v31 = vrot.slane %v1202_v2, 2  ;;  %vm230_vm3 = vcmp.ge.s32.totalorder %v228_v21, 0 }
 0x1a5   :  { %v1389_v27 = vsel %vm263_vm8, %v1387_v61, %v1388_v51 }
 0x1a6   :  { %v1242_v37 = vpop.permute.xlu0 %1241  ;;  %v1204_v9 = vsel %vm252_vm7, %v1202_v2, %v1203_v31  ;;  %v1370_v2 = vmul.f32 %v1369_v50, %v1963_v28 }
 0x1a7   :  { %v902_v3 = vpop.permute.xlu1 %901  ;;  %v1206_v20 = vadd.f32 %v1204_v9, %v1195_v1  ;;  %v1243_v62 = vrot.slane %v1242_v37, 2 }
 0x1a8   :  { %v903_v19 = vrot.slane %v902_v3, 2  ;;  %v1381_v57 = vadd.f32 %v1379_v47, %v1370_v2 }
 0x1a9   :  { %v1244_v42 = vsel %vm296_vm12, %v1242_v37, %v1243_v62 }
 0x1aa   :  { %v904_v11 = vsel %vm307_vm11, %v902_v3, %v903_v19  ;;  %v1397_v40 = vpop.permute.xlu0 %1396  ;;  %v1391_v19 = vadd.f32 %v1389_v27, %v1381_v57 }
 0x1ab   :  { %v906_v43 = vadd.f32 %v904_v11, %v896_v29  ;;  %v1057_v34 = vpop.permute.xlu1 %1056  ;;  %v1398_v46 = vrot.slane %v1397_v40, 2 }
 0x1ac   :  { %v1058_v49 = vrot.slane %v1057_v34, 2 }
 0x1ad   :  { %v907_v14 = vmul.f32 %v906_v43, %v2234_v23  ;;  %v1399_v28 = vsel %vm274_vm9, %v1397_v40, %v1398_v46  ;;  %v241_v46 = vstv %s239_s20 }
 0x1ae   :  { %v1059_v60 = vsel %vm285_vm10, %v1057_v34, %v1058_v49  ;;  %v1252_v10 = vpop.permute.xlu0 %1251  ;;  %v1401_v53 = vadd.f32 %v1399_v28, %v1391_v19 }
 0x1af   :  { %v1061_v36 = vadd.f32 %v1059_v60, %v1051_v56  ;;  %v1212_v45 = vpop.permute.xlu1 %1211  ;;  %909 = vrot.lane.b32.xlu1 %v907_v14, %s1723_s0  ;;  %v1253_v0 = vrot.slane %v1252_v10, 2 }
 0x1b0   :  { %v1213_v23 = vrot.slane %v1212_v45, 2 }
 0x1b1   :  { %v1071_v48 = vadd.f32 %v1069_v35, %v1061_v36  ;;  %v1254_v24 = vsel %vm307_vm11, %v1252_v10, %v1253_v0 }
 0x1b2   :  { %v1214_v17 = vsel %vm263_vm8, %v1212_v45, %v1213_v23  ;;  %v1407_v54 = vpop.permute.xlu0 %1406 }
 0x1b3   :  { %v1081_v30 = vadd.f32 %v1079_v38, %v1071_v48  ;;  %v1216_v63 = vadd.f32 %v1214_v17, %v1206_v20  ;;  %v1327_v52 = vpop.permute.xlu1 %1326  ;;  %v1408_v59 = vrot.slane %v1407_v54, 2  ;;  %v251_v20 = vrot.slane %v1979_v44, 2  ;;  %v240_v17 = vld [vmem:[#allocation2] sm:$0xf] }
 0x1b4   :  { %v1328_v55 = vrot.slane %v1327_v52, 2  ;;  %v227_v38 = vadd.s32 4294967293, %v1762_v15 }
 0x1b5   :  { %v1226_v13 = vadd.f32 %v1224_v58, %v1216_v63  ;;  %v1082_v3 = vmul.f32 %v1081_v30, %v2248_v12  ;;  %v1409_v31 = vsel %vm285_vm10, %v1407_v54, %v1408_v59  ;;  %v253_v63 = vsel %vm252_vm7, %v1979_v44, %v251_v20 }
 0x1b6   :  { %v1417_v26 = vpop.permute.xlu0 %1416  ;;  %v1329_v61 = vsel %vm296_vm12, %v1327_v52, %v1328_v55  ;;  %v1411_v39 = vadd.f32 %v1409_v31, %v1401_v53  ;;  %v325_v52 = vld [vmem:[#allocation2 + $0x6] sm:$0xf]  ;;  %v326_v54 = vstv %s1505_s22  ;;  %v242_v55 = vmul.f32 %v241_v46, %v240_v17 }
 0x1b7   :  { %v1236_v29 = vadd.f32 %v1234_v41, %v1226_v13  ;;  %v1337_v4 = vpop.permute.xlu1 %1336  ;;  %1084 = vrot.lane.b32.xlu1 %v1082_v3, %s1724_s5  ;;  %v1418_v12 = vrot.slane %v1417_v26, 2  ;;  %v1331_v25 = vadd.f32 %v1329_v61, %v2270_v16  ;;  %vm229_vm6 = vcmp.ge.s32.totalorder %v227_v38, 0 }
 0x1b8   :  { %v1338_v11 = vrot.slane %v1337_v4, 2  ;;  %v255_v13 = vadd.f32 %v253_v63, %v242_v55  ;;  %v327_v3 = vmul.f32 %v326_v54, %v325_v52 }
 0x1b9   :  { %v1246_v43 = vadd.f32 %v1244_v42, %v1236_v29  ;;  %v1419_v40 = vsel %vm296_vm12, %v1417_v26, %v1418_v12  ;;  %v1498_v26 = vsel %vm230_vm3, 1.0, %v1708_v32 }
 0x1ba   :  { %v1339_v34 = vsel %vm307_vm11, %v1337_v4, %v1338_v11  ;;  %v1427_v33 = vpop.permute.xlu0 %1426  ;;  %v1421_v60 = vadd.f32 %v1419_v40, %v1411_v39  ;;  %v1497_v4 = vsel %vm229_vm6, 1.0, %v1708_v32 }
 0x1bb   :  { %v1256_v37 = vadd.f32 %v1254_v24, %v1246_v43  ;;  %v1353_v49 = vpop.permute.xlu1 %1352  ;;  %v1428_v14 = vrot.slane %v1427_v33, 2  ;;  %v1341_v9 = vadd.f32 %v1339_v34, %v1331_v25 }
 0x1bc   :  { %v1354_v56 = vrot.slane %v1353_v49, 6 }
 0x1bd   :  { %v1257_v7 = vmul.f32 %v1256_v37, %v2266_v8  ;;  %v1429_v1 = vsel %vm307_vm11, %v1427_v33, %v1428_v14 }
 0x1be   :  { %v1356_v50 = vsel %vm1355_vm2, %v1354_v56, %v1353_v49  ;;  %v1431_v45 = vadd.f32 %v1429_v1, %v1421_v60  ;;  %v335_v35 = vpop.permute.xlu0 %334  ;;  %v313_v49 = vcombine.low %v1497_v4, %v1498_v26 }
 0x1bf   :  { %v1358_v36 = vmul.f32 %v1356_v50, %v1341_v9  ;;  %1259 = vrot.lane.b32.xlu1 %v1257_v7, %s1725_s7  ;;  %v261_v16 = vpop.permute.xlu1 %260  ;;  %v336_v62 = vrot.slane %v335_v35, 2 }
 0x1c0   :  { %v1432_v10 = vmul.f32 %v1431_v45, %v1356_v50  ;;  %v262_v2 = vrot.slane %v261_v16, 2  ;;  %v320_v9 = vrot.slane %v313_v49, %v1766_v18  ;;  %v226_v45 = vstv %s2405_s2  ;;  %s1728_s2 = smov [#allocation9]  }
 0x1c1   :  { %1360 = vrot.lane.b32.xlu0 %v1358_v36, %s1726_s17  ;;  %v337_v15 = vsel %vm252_vm7, %v335_v35, %v336_v62  ;;  %vm838_vm7 = vcmask 1022976   ;;  %s1484_s24 = sshll.u32 %s1728_s2, 4  ;;  %s1485_s24 = int_to_ptr.vmem [resolvable:$true] %s1484_s24 }
 0x1c2   :  { %v345_v51 = vpop.permute.xlu0 %344  ;;  %v264_v59 = vsel %vm263_vm8, %v261_v16, %v262_v2  ;;  %v339_v29 = vadd.f32 %v337_v15, %v327_v3  ;;  %s1675_s25 = scalar_lea.vmem %s1485_s24, 256  ;;  %p1680_p11 = scmp.lt.s32.totalorder %s1485_s24, %s1485_s24 }
 0x1c3   :  { %1434 = vrot.lane.b32.xlu1 %v1432_v10, %s1726_s17  ;;  %v272_v6 = vpop.permute.xlu1 %271  ;;  %v346_v27 = vrot.slane %v345_v51, 2  ;;  %v266_v42 = vadd.f32 %v264_v59, %v255_v13  ;;  %p1676_p10 = scmp.ne.s32.totalorder %s1485_s24, %s1675_s25  ;;  %p1681_p12 = scmp.lt.s32.totalorder %s1675_s25, %s1675_s25 }
 0x1c4   :  { %v273_v58 = vrot.slane %v272_v6, 2 }
 0x1c5   :  { %v347_v44 = vsel %vm263_vm8, %v345_v51, %v346_v27  ;;  %vm1013_vm8 = vcmask 1014784   ;;  %p1682_p13 = por %p1681_p12, %p1680_p11 }
 0x1c6   :  { %v355_v8 = vpop.permute.xlu0 %354  ;;  %v275_v28 = vsel %vm274_vm9, %v272_v6, %v273_v58  ;;  %v349_v24 = vadd.f32 %v347_v44, %v339_v29 }
 0x1c7   :  { %v283_v23 = vpop.permute.xlu1 %282  ;;  %v356_v57 = vrot.slane %v355_v8, 2  ;;  %v277_v43 = vadd.f32 %v275_v28, %v266_v42  ;;  %p1683_p0 = pnand %p1682_p13, %p1676_p10 }
 0x1c8   :  { %v284_v22 = vrot.slane %v283_v23, 2 }
 0x1c9   :  { %v357_v11 = vsel %vm274_vm9, %v355_v8, %v356_v57  ;;  %vm1188_vm9 = vcmask 1006592  }
 0x1ca   :  { %v365_v48 = vpop.permute.xlu0 %364  ;;  %v286_v31 = vsel %vm285_vm10, %v283_v23, %v284_v22  ;;  %v359_v39 = vadd.f32 %v357_v11, %v349_v24 }
 0x1cb   :  { %v294_v47 = vpop.permute.xlu1 %293  ;;  %v366_v19 = vrot.slane %v365_v48, 2  ;;  %v288_v25 = vadd.f32 %v286_v31, %v277_v43 }
 0x1cc   :  { %v295_v0 = vrot.slane %v294_v47, 2 }
 0x1cd   :  { %v367_v40 = vsel %vm285_vm10, %v365_v48, %v366_v19  ;;  %vm1363_vm10 = vcmask 998400  }
 0x1ce   :  { %v375_v41 = vpop.permute.xlu0 %374  ;;  %v297_v34 = vsel %vm296_vm12, %v294_v47, %v295_v0  ;;  %v369_v14 = vadd.f32 %v367_v40, %v359_v39 }
 0x1cf   :  { %v305_v30 = vpop.permute.xlu1 %304  ;;  %v376_v53 = vrot.slane %v375_v41, 2  ;;  %v299_v56 = vadd.f32 %v297_v34, %v288_v25 }
 0x1d0   :  { %v306_v12 = vrot.slane %v305_v30, 2 }
 0x1d1   :  { %v377_v32 = vsel %vm296_vm12, %v375_v41, %v376_v53 }
 0x1d2   :  { %v308_v33 = vsel %vm307_vm11, %v305_v30, %v306_v12  ;;  %v379_v50 = vadd.f32 %v377_v32, %v369_v14  ;;  %v488_v16 = vpop.permute.xlu0 %487 }
 0x1d3   :  { %v385_v61 = vpop.permute.xlu1 %384  ;;  %v310_v60 = vadd.f32 %v308_v33, %v299_v56  ;;  %v489_v51 = vrot.slane %v488_v16, 2  ;;  %v1727_v56 = vmov 1966171168  }
 0x1d4   :  { %v386_v37 = vrot.slane %v385_v61, 2  ;;  %v1448_v14 = vunpack.c.l.s4 %v1727_v56 }
 0x1d5   :  { %v322_v36 = vmul.f32 %v320_v9, %v310_v60  ;;  %v491_v48 = vsel %vm490_vm4, %v488_v16, %v489_v51  ;;  %v1457_v60 = vsub.s32 0, %v1758_v5 }
 0x1d6   :  { %v387_v7 = vsel %vm307_vm11, %v385_v61, %v386_v37  ;;  %v663_v47 = vpop.permute.xlu0 %662 }
 0x1d7   :  { %v389_v1 = vadd.f32 %v387_v7, %v379_v50  ;;  %v323_v6 = vadd.f32 %v322_v36, %v226_v45  ;;  %v664_v21 = vrot.slane %v663_v47, 2  ;;  %v1449_v7 = vunpack.c.0.s8 %v1448_v14 }
 0x1d8   :  { %v1461_v50 = vsub.s32 1, %v1758_v5 }
 0x1d9   :  { %v390_v10 = vmul.f32 %v389_v1, %v320_v9  ;;  %v666_v62 = vsel %vm665_vm5, %v663_v47, %v664_v21  ;;  %v1452_v9 = vsub.s32 %v1449_v7, %v1758_v5 }
 0x1da   :  { %v836_v2 = vpop.permute.xlu0 %835 }
 0x1db   :  { %v391_v8 = vadd.f32 %v390_v10, %v323_v6  ;;  %v837_v54 = vrot.slane %v836_v2, 2 }
 0x1dd   :  { %v493_v38 = vadd.f32 %v491_v48, %v391_v8  ;;  %v839_v59 = vsel %vm838_vm7, %v836_v2, %v837_v54  ;;  %v1641_v8 = vld [vmem:[#allocation4] sm:$0xff] }
 0x1de   :  { %v1011_v55 = vpop.permute.xlu0 %1010 }
 0x1df   :  { %v1012_v57 = vrot.slane %v1011_v55, 2 }
 0x1e1   :  { %v1014_v44 = vsel %vm1013_vm8, %v1011_v55, %v1012_v57 }
 0x1ed   :  { %v1186_v28 = vpop.permute.xlu0 %1185 }
 0x1ee   :  { %v1187_v42 = vrot.slane %v1186_v28, 2 }
 0x1f0   :  { %v1189_v26 = vsel %vm1188_vm9, %v1186_v28, %v1187_v42 }
 0x209   :  { %v562_v35 = vpop.permute.xlu1 %561 }
 0x20a   :  { %v563_v23 = vrot.slane %v562_v35, 2 }
 0x20c   :  { %v564_v18 = vsel %vm490_vm4, %v562_v35, %v563_v23 }
 0x20d   :  { %v566_v17 = vadd.f32 %v564_v18, %v493_v38 }
 0x20f   :  { %v668_v63 = vadd.f32 %v666_v62, %v566_v17 }
 0x211   :  { %v737_v20 = vpop.permute.xlu1 %736 }
 0x212   :  { %v738_v46 = vrot.slane %v737_v20, 2 }
 0x214   :  { %v739_v30 = vsel %vm665_vm5, %v737_v20, %v738_v46  ;;  %v1642_v20 = vld [vmem:[#allocation4 + $0x8] sm:$0xff] }
 0x215   :  { %v741_v27 = vadd.f32 %v739_v30, %v668_v63 }
 0x217   :  { %v841_v22 = vadd.f32 %v839_v59, %v741_v27 }
 0x221   :  { %v910_v52 = vpop.permute.xlu1 %909 }
 0x222   :  { %v911_v58 = vrot.slane %v910_v52, 2 }
 0x224   :  { %v912_v15 = vsel %vm838_vm7, %v910_v52, %v911_v58 }
 0x225   :  { %v914_v13 = vadd.f32 %v912_v15, %v841_v22 }
 0x227   :  { %v1016_v19 = vadd.f32 %v1014_v44, %v914_v13 }
 0x229   :  { %v1085_v3 = vpop.permute.xlu1 %1084 }
 0x22a   :  { %v1086_v41 = vrot.slane %v1085_v3, 2 }
 0x22c   :  { %v1087_v0 = vsel %vm1013_vm8, %v1085_v3, %v1086_v41 }
 0x22d   :  { %v1089_v29 = vadd.f32 %v1087_v0, %v1016_v19 }
 0x22f   :  { %v1191_v31 = vadd.f32 %v1189_v26, %v1089_v29 }
 0x231   :  { %v1260_v4 = vpop.permute.xlu1 %1259 }
 0x232   :  { %v1261_v61 = vrot.slane %v1260_v4, 2 }
 0x233   :  { %v1361_v11 = vpop.permute.xlu0 %1360 }
 0x234   :  { %v1262_v12 = vsel %vm1188_vm9, %v1260_v4, %v1261_v61  ;;  %v1362_v53 = vrot.slane %v1361_v11, 2 }
 0x235   :  { %v1264_v43 = vadd.f32 %v1262_v12, %v1191_v31  ;;  %v1435_v24 = vpop.permute.xlu1 %1434 }
 0x236   :  { %v1364_v34 = vsel %vm1363_vm10, %v1361_v11, %v1362_v53  ;;  %v1436_v40 = vrot.slane %v1435_v24, 2 }
 0x237   :  { %v1366_v37 = vadd.f32 %v1364_v34, %v1264_v43 }
 0x238   :  { %v1437_v25 = vsel %vm1363_vm10, %v1435_v24, %v1436_v40 }
 0x239   :  { %v1439_v39 = vadd.f32 %v1437_v25, %v1366_v37 }
 0x23b   :  { %v1606_v49 = vmul.f32 -1.442695, %v1439_v39 }
 0x23d   :  { %1637 = vpow2.f32 %v1606_v49 }
 0x24a   :  { %v1638_v33 = vpop.eup %1637 }
 0x24b   :  { %v1443_v32 = vadd.f32 1.0, %v1638_v33 }
 0x24d   :  { %1639 = vrcp.f32 %v1443_v32 }
 0x25a   :  { %v1640_v1 = vpop.eup %1639 }
 0x25b   :  { %v1453_v36 = vrot.slane %v1640_v1, %v1452_v9 }
 0x25d   :  { %v1454_v45 = vcombine.high %v1453_v36, %v1453_v36  ;;  %v1458_v10 = vrot.slane %v1453_v36, %v1457_v60  ;;  %v1462_v16 = vrot.slane %v1453_v36, %v1461_v50 }
 0x25f   :  { %v1466_v35 = vrot.slane %v1454_v45, %v1457_v60  ;;  %v1470_v6 = vrot.slane %v1454_v45, %v1461_v50  ;;  %v1471_v51 = vcombine.low %v1458_v10, %v1462_v16 }
 0x261   :  { %v1472_v23 = vcombine.low %v1466_v35, %v1470_v6  ;;  %v1475_v47 = vmul.f32 %v1641_v8, %v1471_v51 }
 0x263   :  { %v1476_v48 = vmul.f32 %v1642_v20, %v1472_v23  ;;  %1477 = vst [vmem:[#allocation9] sm:$0xff] %v1475_v47 }
 0x265   :  { %1478 = vst [vmem:[#allocation9 + $0x8] sm:$0xff] %v1476_v48 }
 0x266   :  { %1686 = shalt.err (!%p1683_p0)
}
 0x267   :  { %1490 = dma.vmem_to_hbm [thread:$0]  %s1485_s24, 256, %s2406_s3, [#allocation6], %s1702_s18, %s1702_s18, %s1703_s19  }
 0x268   :  { %1699 = dma.done.wait [#allocation6], 256  }
 0x269   :  { %1700 = vsyncadd [#allocation6], 4294967040 }
 0x26a   :  { %1494 = vsyncpa [#allocation5], 1 }
 0x26b   :  { %1495 = vsyncpa [#allocation6], 1 }
 0x26c   :  { %1496 = vsyncpa [#allocation7], 1 }

</bundles_post_ra>
